<compile_context>
chip_gen: v6e
topology: v6e:2x2x1
jax: 0.10.0
libtpu: 0.0.40
codegen_flags: <defaults>
</compile_context>

<pallas_src>
import functools

import jax
import jax.numpy as jnp
from jax import lax
from jax.experimental import pallas as pl
from jax.experimental.pallas import tpu as pltpu


def _sdpa_kernel(q_ref, k_ref, v_ref, o_ref, m_sc, l_sc, acc_sc, *, scale):
    # q_ref: (1, tq, d)   k_ref/v_ref: (1, tk, d)   o_ref: (1, tq, d)
    # scratch (persists across the Lkv grid axis):
    #   m_sc (tq, 1) running max, l_sc (tq, 1) running denom, acc_sc (tq, d) f32.
    kv_idx = pl.program_id(2)

    @pl.when(kv_idx == 0)
    def _init():
        m_sc[...] = jnp.full_like(m_sc, -jnp.inf)
        l_sc[...] = jnp.zeros_like(l_sc)
        acc_sc[...] = jnp.zeros_like(acc_sc)

    q = q_ref[0]          # (tq, d) bf16
    k = k_ref[0]          # (tk, d) bf16
    v = v_ref[0]          # (tk, d) bf16

    # Contract the feature axes of q and k directly (MXU-friendly, no k.T relayout).
    s = lax.dot_general(
        q, k,
        dimension_numbers=(((1,), (1,)), ((), ())),
        preferred_element_type=jnp.float32) * scale            # (tq, tk) f32

    # TODO(synk): optional boolean `mask` (masked_fill with -inf) not wired in;
    # module default is mask=None.

    m_prev = m_sc[...]
    m_new = jnp.maximum(m_prev, s.max(axis=-1, keepdims=True))  # (tq, 1)
    alpha = jnp.exp(m_prev - m_new)
    p = jnp.exp(s - m_new)                                      # (tq, tk) f32
    l_sc[...] = alpha * l_sc[...] + p.sum(axis=-1, keepdims=True)
    acc_sc[...] = alpha * acc_sc[...] + jnp.dot(
        p.astype(v.dtype), v, preferred_element_type=jnp.float32)
    m_sc[...] = m_new

    @pl.when(kv_idx == pl.num_programs(2) - 1)
    def _finalize():
        inv_l = pl.reciprocal(l_sc[...], approx=True)           # EUP, not a VPU divide
        o_ref[0] = (acc_sc[...] * inv_l).astype(o_ref.dtype)


def scaled_dot_product_attention(q, k, v, *, dim, tq=128, tk=128):
    """q: (..., Lq, d), k/v: (..., Lkv, d). `dim` mirrors the module's ctor arg."""
    *batch, Lq, d = q.shape
    Lkv = k.shape[-2]
    assert k.shape[-1] == d and v.shape[-1] == d and v.shape[-2] == Lkv

    bh = 1
    for b in batch:
        bh *= b

    tq = min(tq, Lq)
    tk = min(tk, Lkv)
    assert Lq % tq == 0 and Lkv % tk == 0, "sequence lengths must tile evenly"

    # bf16 MXU operands (f32 accumulation inside the kernel); halves HBM/VMEM bytes.
    qf = q.reshape(bh, Lq, d).astype(jnp.bfloat16)
    kf = k.reshape(bh, Lkv, d).astype(jnp.bfloat16)
    vf = v.reshape(bh, Lkv, d).astype(jnp.bfloat16)

    kernel = functools.partial(_sdpa_kernel, scale=1.0 / (dim ** 0.5))

    out = pl.pallas_call(
        kernel,
        out_shape=jax.ShapeDtypeStruct((bh, Lq, d), jnp.float32),
        grid_spec=pltpu.PrefetchScalarGridSpec(
            num_scalar_prefetch=0,
            grid=(bh, Lq // tq, Lkv // tk),       # reduction (Lkv) axis last
            in_specs=[
                pl.BlockSpec((1, tq, d), lambda b, qi, ki: (b, qi, 0)),
                pl.BlockSpec((1, tk, d), lambda b, qi, ki: (b, ki, 0)),
                pl.BlockSpec((1, tk, d), lambda b, qi, ki: (b, ki, 0)),
            ],
            out_specs=pl.BlockSpec((1, tq, d), lambda b, qi, ki: (b, qi, 0)),
            scratch_shapes=[
                pltpu.VMEM((tq, 1), jnp.float32),   # running max
                pltpu.VMEM((tq, 1), jnp.float32),   # running denominator
                pltpu.VMEM((tq, d), jnp.float32),   # f32 output accumulator
            ],
        ),
        compiler_params=pltpu.CompilerParams(
            dimension_semantics=("parallel", "parallel", "arbitrary")),
    )(qf, kf, vf)

    return out.reshape(*batch, Lq, d)


def _reference(q, k, v, *, dim):
    """Plain-JAX mirror of the PyTorch forward (mask=None)."""
    s = jnp.einsum('...id,...jd->...ij', q, k) / (dim ** 0.5)
    attn = jax.nn.softmax(s, axis=-1)
    return jnp.einsum('...ij,...jd->...id', attn, v)


if __name__ == "__main__":
    # Small shapes: 2 batches x 2 heads, seq 256, head dim 128 (lane-dense),
    # tiled 128x128 so the kernel exercises both the Lq and Lkv grid axes.
    B, H, Lq, Lkv, d = 2, 2, 256, 256, 128

    key = jax.random.PRNGKey(0)
    kq, kk, kv = jax.random.split(key, 3)
    q = jax.random.normal(kq, (B, H, Lq, d), dtype=jnp.float32)
    k = jax.random.normal(kk, (B, H, Lkv, d), dtype=jnp.float32)
    v = jax.random.normal(kv, (B, H, Lkv, d), dtype=jnp.float32)

    out = scaled_dot_product_attention(q, k, v, dim=d)
    out = jax.block_until_ready(out)
    assert out.shape == (B, H, Lq, d)

    # Reference on the same bf16-quantized inputs (kernel feeds the MXU in bf16),
    # computed in f32.
    qb = q.astype(jnp.bfloat16).astype(jnp.float32)
    kb = k.astype(jnp.bfloat16).astype(jnp.float32)
    vb = v.astype(jnp.bfloat16).astype(jnp.float32)
    ref = _reference(qb, kb, vb, dim=d)

    assert jnp.allclose(out, ref, atol=2e-2, rtol=2e-2), "mismatch vs reference"
    print("KERNEL_OK")
</pallas_src>

<mosaic_0001>
module attributes {stable_mosaic.version = 11 : i64} {
  func.func @_sdpa_kernel(%arg0: i32, %arg1: i32, %arg2: i32, %arg3: memref<1x128x128xbf16, #tpu.memory_space<vmem>>, %arg4: memref<1x128x128xbf16, #tpu.memory_space<vmem>>, %arg5: memref<1x128x128xbf16, #tpu.memory_space<vmem>>, %arg6: memref<1x128x128xf32, #tpu.memory_space<vmem>>, %arg7: memref<128x1xf32, #tpu.memory_space<vmem>>, %arg8: memref<128x1xf32, #tpu.memory_space<vmem>>, %arg9: memref<128x128xf32, #tpu.memory_space<vmem>>) attributes {dimension_semantics = [#tpu.dimension_semantics<parallel>, #tpu.dimension_semantics<parallel>, #tpu.dimension_semantics<arbitrary>], iteration_bounds = array<i64: 4, 2, 2>, scalar_prefetch = 0 : i64, scratch_operands = 3 : i64, tpu.core_type = #tpu.core_type<tc>, window_params = [{transform_indices = @transform_0, window_bounds = array<i64: 1, 128, 128>}, {transform_indices = @transform_1, window_bounds = array<i64: 1, 128, 128>}, {transform_indices = @transform_2, window_bounds = array<i64: 1, 128, 128>}, {transform_indices = @transform_3, window_bounds = array<i64: 1, 128, 128>}]} {
    %c0_i32 = arith.constant 0 : i32
    %0 = arith.cmpi eq, %arg2, %c0_i32 : i32
    %1 = arith.extui %0 : i1 to i32
    %c0_i32_0 = arith.constant 0 : i32
    %2 = arith.cmpi ne, %1, %c0_i32_0 : i32
    scf.if %2 {
      %cst_26 = arith.constant 0xFF800000 : f32
      %38 = vector.broadcast %cst_26 : f32 to vector<128x1xf32>
      %c0_27 = arith.constant 0 : index
      %c0_28 = arith.constant 0 : index
      %39 = vector.load %arg7[%c0_27, %c0_28] : memref<128x1xf32, #tpu.memory_space<vmem>>, vector<128x1xf32>
      tpu.vector_store %arg7[%c0_27, %c0_28], %38 {strides = array<i32>} : memref<128x1xf32, #tpu.memory_space<vmem>>, vector<128x1xf32>,
      %cst_29 = arith.constant 0.000000e+00 : f32
      %40 = vector.broadcast %cst_29 : f32 to vector<128x1xf32>
      %c0_30 = arith.constant 0 : index
      %c0_31 = arith.constant 0 : index
      %41 = vector.load %arg8[%c0_30, %c0_31] : memref<128x1xf32, #tpu.memory_space<vmem>>, vector<128x1xf32>
      tpu.vector_store %arg8[%c0_30, %c0_31], %40 {strides = array<i32>} : memref<128x1xf32, #tpu.memory_space<vmem>>, vector<128x1xf32>,
      %cst_32 = arith.constant 0.000000e+00 : f32
      %42 = vector.broadcast %cst_32 : f32 to vector<128x128xf32>
      %c0_33 = arith.constant 0 : index
      %c0_34 = arith.constant 0 : index
      %43 = vector.load %arg9[%c0_33, %c0_34] : memref<128x128xf32, #tpu.memory_space<vmem>>, vector<128x128xf32>
      tpu.vector_store %arg9[%c0_33, %c0_34], %42 {strides = array<i32>} : memref<128x128xf32, #tpu.memory_space<vmem>>, vector<128x128xf32>,
    } else {
    }
    %c0 = arith.constant 0 : index
    %c0_1 = arith.constant 0 : index
    %c0_2 = arith.constant 0 : index
    %3 = vector.load %arg3[%c0, %c0_1, %c0_2] : memref<1x128x128xbf16, #tpu.memory_space<vmem>>, vector<1x128x128xbf16>
    %4 = vector.shape_cast %3 : vector<1x128x128xbf16> to vector<128x128xbf16>
    %c0_3 = arith.constant 0 : index
    %c0_4 = arith.constant 0 : index
    %c0_5 = arith.constant 0 : index
    %5 = vector.load %arg4[%c0_3, %c0_4, %c0_5] : memref<1x128x128xbf16, #tpu.memory_space<vmem>>, vector<1x128x128xbf16>
    %6 = vector.shape_cast %5 : vector<1x128x128xbf16> to vector<128x128xbf16>
    %c0_6 = arith.constant 0 : index
    %c0_7 = arith.constant 0 : index
    %c0_8 = arith.constant 0 : index
    %7 = vector.load %arg5[%c0_6, %c0_7, %c0_8] : memref<1x128x128xbf16, #tpu.memory_space<vmem>>, vector<1x128x128xbf16>
    %8 = vector.shape_cast %7 : vector<1x128x128xbf16> to vector<128x128xbf16>
    %cst = arith.constant dense<0.000000e+00> : vector<128x128xf32>
    %9 = tpu.matmul %4, %6, %cst {dimension_numbers = #tpu.dot_dimension_numbers<[1], [1], [0], [0], [0, 0, 1, 0], [], []>} : vector<128x128xbf16>, vector<128x128xbf16>, vector<128x128xf32> -> vector<128x128xf32>
    %cst_9 = arith.constant 0.0883883461 : f32
    %10 = vector.broadcast %cst_9 : f32 to vector<128x128xf32>
    %11 = arith.mulf %9, %10 : vector<128x128xf32>
    %c0_10 = arith.constant 0 : index
    %c0_11 = arith.constant 0 : index
    %12 = vector.load %arg7[%c0_10, %c0_11] : memref<128x1xf32, #tpu.memory_space<vmem>>, vector<128x1xf32>
    %cst_12 = arith.constant dense<0xFF800000> : vector<128xf32>
    %13 = vector.multi_reduction <maximumf>, %11, %cst_12 [1] : vector<128x128xf32> to vector<128xf32>
    %14 = vector.shape_cast %13 : vector<128xf32> to vector<128x1xf32>
    %15 = arith.maximumf %12, %14 : vector<128x1xf32>
    %16 = arith.subf %12, %15 : vector<128x1xf32>
    %17 = math.exp %16 : vector<128x1xf32>
    %18 = vector.broadcast %15 : vector<128x1xf32> to vector<128x128xf32>
    %19 = arith.subf %11, %18 : vector<128x128xf32>
    %20 = math.exp %19 : vector<128x128xf32>
    %c0_13 = arith.constant 0 : index
    %c0_14 = arith.constant 0 : index
    %21 = vector.load %arg8[%c0_13, %c0_14] : memref<128x1xf32, #tpu.memory_space<vmem>>, vector<128x1xf32>
    %22 = arith.mulf %17, %21 : vector<128x1xf32>
    %cst_15 = arith.constant dense<0.000000e+00> : vector<128xf32>
    %23 = vector.multi_reduction <add>, %20, %cst_15 [1] : vector<128x128xf32> to vector<128xf32>
    %24 = vector.shape_cast %23 : vector<128xf32> to vector<128x1xf32>
    %25 = arith.addf %22, %24 : vector<128x1xf32>
    %c0_16 = arith.constant 0 : index
    %c0_17 = arith.constant 0 : index
    %26 = vector.load %arg8[%c0_16, %c0_17] : memref<128x1xf32, #tpu.memory_space<vmem>>, vector<128x1xf32>
    tpu.vector_store %arg8[%c0_16, %c0_17], %25 {strides = array<i32>} : memref<128x1xf32, #tpu.memory_space<vmem>>, vector<128x1xf32>,
    %c0_18 = arith.constant 0 : index
    %c0_19 = arith.constant 0 : index
    %27 = vector.load %arg9[%c0_18, %c0_19] : memref<128x128xf32, #tpu.memory_space<vmem>>, vector<128x128xf32>
    %28 = vector.broadcast %17 : vector<128x1xf32> to vector<128x128xf32>
    %29 = arith.mulf %28, %27 : vector<128x128xf32>
    %30 = arith.truncf %20 : vector<128x128xf32> to vector<128x128xbf16>
    %cst_20 = arith.constant dense<0.000000e+00> : vector<128x128xf32>
    %31 = tpu.matmul %30, %8, %cst_20 {dimension_numbers = #tpu.dot_dimension_numbers<[1], [0], [0], [1], [0, 0, 1, 1], [], []>} : vector<128x128xbf16>, vector<128x128xbf16>, vector<128x128xf32> -> vector<128x128xf32>
    %32 = arith.addf %29, %31 : vector<128x128xf32>
    %c0_21 = arith.constant 0 : index
    %c0_22 = arith.constant 0 : index
    %33 = vector.load %arg9[%c0_21, %c0_22] : memref<128x128xf32, #tpu.memory_space<vmem>>, vector<128x128xf32>
    tpu.vector_store %arg9[%c0_21, %c0_22], %32 {strides = array<i32>} : memref<128x128xf32, #tpu.memory_space<vmem>>, vector<128x128xf32>,
    %c0_23 = arith.constant 0 : index
    %c0_24 = arith.constant 0 : index
    %34 = vector.load %arg7[%c0_23, %c0_24] : memref<128x1xf32, #tpu.memory_space<vmem>>, vector<128x1xf32>
    tpu.vector_store %arg7[%c0_23, %c0_24], %15 {strides = array<i32>} : memref<128x1xf32, #tpu.memory_space<vmem>>, vector<128x1xf32>,
    %c1_i32 = arith.constant 1 : i32
    %35 = arith.cmpi eq, %arg2, %c1_i32 : i32
    %36 = arith.extui %35 : i1 to i32
    %c0_i32_25 = arith.constant 0 : i32
    %37 = arith.cmpi ne, %36, %c0_i32_25 : i32
    scf.if %37 {
      %c0_26 = arith.constant 0 : index
      %c0_27 = arith.constant 0 : index
      %38 = vector.load %arg8[%c0_26, %c0_27] : memref<128x1xf32, #tpu.memory_space<vmem>>, vector<128x1xf32>
      %39 = tpu.reciprocal %38 {approx = true} : vector<128x1xf32> -> vector<128x1xf32>
      %c0_28 = arith.constant 0 : index
      %c0_29 = arith.constant 0 : index
      %40 = vector.load %arg9[%c0_28, %c0_29] : memref<128x128xf32, #tpu.memory_space<vmem>>, vector<128x128xf32>
      %41 = vector.broadcast %39 : vector<128x1xf32> to vector<128x128xf32>
      %42 = arith.mulf %40, %41 : vector<128x128xf32>
      %c0_30 = arith.constant 0 : index
      %c0_31 = arith.constant 0 : index
      %c0_32 = arith.constant 0 : index
      %43 = vector.load %arg6[%c0_30, %c0_31, %c0_32] : memref<1x128x128xf32, #tpu.memory_space<vmem>>, vector<1x128x128xf32>
      %44 = vector.shape_cast %43 : vector<1x128x128xf32> to vector<128x128xf32>
      %45 = vector.shape_cast %42 : vector<128x128xf32> to vector<1x128x128xf32>
      tpu.vector_store %arg6[%c0_30, %c0_31, %c0_32], %45 {strides = array<i32>} : memref<1x128x128xf32, #tpu.memory_space<vmem>>, vector<1x128x128xf32>,
    } else {
    }
    return
  }
  func.func @transform_0(%arg0: i32, %arg1: i32, %arg2: i32) -> (i32, i32, i32) {
    %c0_i32 = arith.constant 0 : i32
    %c0_i32_0 = arith.constant 0 : i32
    return %arg0, %arg1, %c0_i32 : i32, i32, i32
  }
  func.func @transform_1(%arg0: i32, %arg1: i32, %arg2: i32) -> (i32, i32, i32) {
    %c0_i32 = arith.constant 0 : i32
    %c0_i32_0 = arith.constant 0 : i32
    return %arg0, %arg2, %c0_i32 : i32, i32, i32
  }
  func.func @transform_2(%arg0: i32, %arg1: i32, %arg2: i32) -> (i32, i32, i32) {
    %c0_i32 = arith.constant 0 : i32
    %c0_i32_0 = arith.constant 0 : i32
    return %arg0, %arg2, %c0_i32 : i32, i32, i32
  }
  func.func @transform_3(%arg0: i32, %arg1: i32, %arg2: i32) -> (i32, i32, i32) {
    %c0_i32 = arith.constant 0 : i32
    %c0_i32_0 = arith.constant 0 : i32
    return %arg0, %arg1, %c0_i32 : i32, i32, i32
  }
}

</mosaic_0001>

<bundles_post_ra>
// kernel: tpu_custom_call.1
= control target key start
LH: loop header
LB: loop body
LE: loop exit
PB: predicated region body
PF: predicated region fallthrough
CT: control target
= control target key end

     0   :  { %s3019_s0 = inlined_call_operand.hbm [shape: bf16[4,256,128], index: 0, kind: input, shape index: {}]   ;;  %s3020_s1 = inlined_call_operand.hbm [shape: bf16[4,256,128], index: 1, kind: input, shape index: {}]   ;;  %s3021_s2 = inlined_call_operand.hbm [shape: bf16[4,256,128], index: 2, kind: input, shape index: {}]   ;;  %s3022_s3 = inlined_call_operand.hbm [shape: f32[4,256,128], index: 3, kind: output, shape index: {}]  }
   0x1   :  { %3048 = sst [smem:[#allocation30_spill]] %s3020_s1 }
   0x2   :  { %3049 = sst [smem:[#allocation31_spill]] %s3021_s2 }
   0x3   :  { %3050 = sst [smem:[#allocation32_spill]] %s3022_s3 }
   0x4   :  { %8 = vsyncpa [#allocation6], 0 }
   0x5   :  { %10 = vsyncpa [#allocation6 + $0x1], 0 }
   0x6   :  { %11 = vsyncpa [#allocation9], 0 }
   0x7   :  { %13 = vsyncpa [#allocation9 + $0x1], 0 }
   0x8   :  { %14 = vsyncpa [#allocation7], 0 }
   0x9   :  { %16 = vsyncpa [#allocation7 + $0x1], 0  ;;  %s2256_s12 = smov 0   ;;  %s2258_s13 = smov 0  }
   0xa   :  { %s2260_s14 = smov 0   ;;  %s2262_s15 = smov 0  }
   0xb   :  { %s2264_s16 = smov 0   ;;  %s2266_s17 = smov 0  }
   0xc   :  { %s2268_s18 = smov 0   ;;  %s2270_s19 = smov 0  }
   0xd   :  { %s2272_s20 = smov 0   ;;  %s2274_s21 = smov 0  }
   0xe   :  { %s2276_s22 = smov 0   ;;  %s2278_s23 = smov 0  }
   0xf   :  { %s2280_s24 = smov 0  }
  0x10 LB: > { %3051 = sst [smem:[#allocation15_spill]] %s2178_s13  ;;  %s2320_s25 = sadd.s32 4294967295, %s2222_s24   ;;  %s2222_s24 = sphi %s2280_s24, %s22_s24   ;;  %s2218_s23 = sphi %s2278_s23, %s3117_s23   ;;  %s2214_s22 = sphi %s2276_s22, %s3108_s22   ;;  %s2210_s21 = sphi %s2274_s21, %s3116_s21   ;;  %s2206_s20 = sphi %s2272_s20, %s3115_s20   ;;  %s2202_s19 = sphi %s2270_s19, %s3107_s19   ;;  %s2198_s18 = sphi %s2268_s18, %s3114_s18   ;;  %s2194_s17 = sphi %s2266_s17, %s3113_s17   ;;  %s2190_s16 = sphi %s2264_s16, %s3112_s16   ;;  %s2186_s15 = sphi %s2262_s15, %s3105_s15   ;;  %s2182_s14 = sphi %s2260_s14, %s3111_s14   ;;  %s2178_s13 = sphi %s2258_s13, %s3110_s13   ;;  %s2174_s12 = sphi %s2256_s12, %s3104_s12  }
  0x11   : > { %3052 = sst [smem:[#allocation16_spill]] %s2186_s15  ;;  %s34_s26 = sadd.s32 1, %s2210_s21 }
  0x12   : > { %3053 = sst [smem:[#allocation17_spill]] %s2190_s16  ;;  %p2323_p0 = scmp.ge.s32.totalorder %s34_s26, 2 }
  0x13   : > { %3054 = sst [smem:[#allocation18_spill]] %s2198_s18  ;;  %p58_p1 = scmp.eq.s32.totalorder %s2222_s24, 0 }
  0x14   : > { %3055 = sst [smem:[#allocation19_spill]] %s2202_s19  ;;  %p64_p2 = scmp.eq.s32.totalorder %s2320_s25, 0 }
  0x15   : > { %3056 = sst [smem:[#allocation20_spill]] %s2206_s20  ;;  %s3119_s26 = smov (%p2323_p0, %s34_s26), 0 }
  0x16   : > { %3057 = sst [smem:[#allocation21_spill]] %s2214_s22  ;;  %p85_p3 = scmp.ne.s32.totalorder %s2182_s14, %s2178_s13 }
  0x17   : > { %3058 = sst [smem:[#allocation22_spill]] %s2320_s25  ;;  %p91_p4 = scmp.ne.s32.totalorder %s2178_s13, %s2174_s12 }
  0x18   : > { %p2340_p5 = por %p85_p3, %p58_p1  ;;  %p1760_p7 = scmp.lt.s32.totalorder %s2222_s24, 16 }
  0x19   : > { %p2346_p6 = por %p91_p4, %p64_p2  ;;  %s3026_s5 = sshll.u32 %s2218_s23, 5 }
  0x1a   : > { %s194_s6 = sand.u32 1, %s2222_s24   ;;  %s196_s7 = sand.u32 1, %s2182_s14  }
  0x1b   : > { %s3061_s4 = scalar_select %p2346_p6, 1, 0 }
  0x1c   : > { %s1597_s8 = sshll.u32 %s196_s7, 6  ;;  %s1598_s9 = sshll.u32 %s2210_s21, 4 }
  0x1d   : > { %3062 = sst [smem:[#allocation23_spill]] %s3061_s4  ;;  %s204_s10 = sadd.s32 %s1598_s9, %s3026_s5 }
  0x1e   : > { %s1600_s11 = sshll.u32 %s204_s10, 6  ;;  %s198_s12 = scalar_lea.vmem [#allocation8], %s1597_s8 }
  0x1f   : > { %s207_s29 = sshll.u32 %s198_s12, 4  ;;  %s3063_s1 = sld [smem:[#allocation30_spill]]  ;;  %s208_s29 = int_to_ptr.vmem [resolvable:$true] %s207_s29 }
  0x20   : > { %p2364_p8 = pnand %p1760_p7, %p2340_p5  ;;  %s3065_s2 = sld [smem:[#allocation31_spill]] }
  0x21   : > { %s221_s10 = scalar_lea.vmem [#allocation10], %s1597_s8  ;;  %s2375_s5 = scalar_lea.sflag [#allocation9], %s194_s6 }
  0x22   : > { %s230_s12 = sshll.u32 %s221_s10, 4  ;;  %p3027_p9 = pneg %p2364_p8  ;;  %s2394_s12 = int_to_ptr.vmem [resolvable:$true] %s230_s12 }
  0x23   : > { %s2011_s3 = scalar_lea.vmem %s208_s29, 1024  ;;  %s2224_s28 = smov [#allocation8]  }
  0x24   : > { %p2012_p10 = scmp.ne.s32.totalorder %s208_s29, %s2011_s3  ;;  %s2016_s30 = sshll.u32 %s2224_s28, 4  ;;  %s2017_s30 = int_to_ptr.vmem [resolvable:$false] %s2016_s30 }
  0x25   : > { %s206_s20 = scalar_lea.hbm %s3063_s1, %s1600_s11  ;;  %s2018_s7 = scalar_lea.vmem %s2017_s30, 2048 }
  0x26   : > { %s2373_s9 = scalar_lea.hbm %s3065_s2, %s1600_s11  ;;  %p2014_p11 = pnand %p2012_p10, %p3027_p9 }
  0x27   : > { %p2019_p13 = scmp.lt.s32.totalorder %s208_s29, %s2017_s30  ;;  %p2020_p3 = scmp.lt.s32.totalorder %s2018_s7, %s2011_s3 }
  0x28   : > { %p2015_p12 = pneg %p2014_p11 }
  0x29   : > { %p2021_p4 = por %p2020_p3, %p2019_p13 }
  0x2b   : > { %p2022_p5 = pnand %p2021_p4, %p2015_p12 }
  0x2d   : > { %2025 = shalt.err (!%p2022_p5)
}
  0x2e   : > { %s3028_s18 = smov 64   ;;  %s3030_s4 = smov 4  }
  0x2f   : > { %1752 = dma.hbm_to_vmem [thread:$0]  (!%p2364_p8), %s206_s20, 1024, %s208_s29, %s2375_s5, %s3028_s18, %s3028_s18, %s3030_s4  }
  0x30   : > { %p1605_p10 = scmp.ge.s32.totalorder %s2222_s24, 1  ;;  %p238_p11 = scmp.lt.s32.totalorder %s2222_s24, 17 }
  0x31   : > { %s1590_s8 = sadd.s32 4294967294, %s2222_s24   ;;  %s37_s11 = sadd.s32 1, %s2214_s22 }
  0x32   : > { %p2390_p12 = pnand %p1605_p10, %p238_p11  ;;  %s3121_s11 = smov (!%p2323_p0, %s37_s11), %s2214_s22 }
  0x33   : > { %p57_p13 = scmp.ne.s32.totalorder %s2194_s17, %s2190_s16  ;;  %p63_p3 = scmp.ne.s32.totalorder %s2190_s16, %s2186_s15 }
  0x34   : > { %s3066_s6 = scalar_select %p2390_p12, 1, 0 }
  0x35   : > { %p39_p4 = scmp.ge.s32.totalorder %s3121_s11, 2  ;;  %p145_p5 = scmp.eq.s32.totalorder %s2320_s25, 15 }
  0x36   : > { %3067 = sst [smem:[#allocation24_spill]] %s3066_s6  ;;  %s50_s20 = sadd.s32 1, %s2194_s17 }
  0x37   : > { %p2412_p10 = por %p64_p2, %p63_p3  ;;  %s3123_s11 = smov (%p39_p4, %s3121_s11), 0 }
  0x38   : > { %3070 = sst [smem:[#allocation26_spill]] %s3123_s11  ;;  %s3071_s27 = sadd.s32 1, %s2218_s23 }
  0x39   : > { %s3068_s29 = scalar_select %p2412_p10, 1, 0 }
  0x3a   : > { %s3125_s27 = smov (!%p39_p4, %s3071_s27), %s2218_s23  ;;  %p2423_p0 = por %p58_p1, %p57_p13 }
  0x3b   : > { %3069 = sst [smem:[#allocation25_spill]] %s3068_s29  ;;  %p2427_p11 = por %p145_p5, %p57_p13 }
  0x3c   : > { %p43_p2 = scmp.ge.s32.totalorder %s3125_s27, 4  ;;  %p151_p9 = scmp.eq.s32.totalorder %s1590_s8, 15 }
  0x3d   : > { %s3073_s10 = scalar_select %p2427_p11, 1, 0 }
  0x3e   : > { %s46_s3 = ssub.s32 %s2214_s22, %s3123_s11  ;;  %s3045_s28 = sand.u32 1, %s2194_s17  }
  0x3f   : > { %3074 = sst [smem:[#allocation27_spill]] %s3073_s10  ;;  %s3127_s27 = smov (%p43_p2, %s3125_s27), 0 }
  0x40   : > { %3075 = sst [smem:[#allocation28_spill]] %s3127_s27  ;;  %p2439_p4 = por %p151_p9, %p63_p3 }
  0x41   : > { %s1594_s18 = sshll.u32 %s2214_s22, 4  ;;  %s45_s4 = ssub.s32 %s2218_s23, %s3127_s27 }
  0x42   : > { %s3076_s30 = scalar_select %p2439_p4, 1, 0 }
  0x43   : > { %s1593_s1 = sshll.u32 %s3045_s28, 6  ;;  %s47_s8 = sor.u32 %s46_s3, %s45_s4 }
  0x44   : > { %3077 = sst [smem:[#allocation29_spill]] %s3076_s30  ;;  %s3078_s2 = ssub.s32 %s2210_s21, %s3119_s26 }
  0x45   : > { %s75_s11 = sor.u32 %s3078_s2, %s45_s4  ;;  %p48_p1 = scmp.eq.s32.totalorder %s47_s8, 0 }
  0x46   : > { %p76_p13 = scmp.eq.s32.totalorder %s75_s11, 0  ;;  %s3079_s15 = sshll.u32 %s2218_s23, 5 }
  0x47   : > { %s181_s10 = sadd.s32 %s3079_s15, %s1594_s18  ;;  %s3080_s25 = sadd.s32 1, %s2182_s14 }
  0x48   : > { %s2454_s13 = scalar_select %p48_p1, %s2194_s17, %s50_s20  }
  0x49   : > { %s2459_s30 = scalar_select %p76_p13, %s2182_s14, %s3080_s25  }
  0x4a   : > { %s1596_s22 = sshll.u32 %s181_s10, 6  ;;  %s175_s29 = scalar_lea.vmem [#allocation5], %s1593_s1 }
  0x4b   : > { %s184_s27 = sshll.u32 %s175_s29, 4  ;;  %s2464_s28 = scalar_lea.hbm %s3019_s0, %s1596_s22  ;;  %s2466_s27 = int_to_ptr.vmem [resolvable:$true] %s184_s27 }
  0x4c   : > { %p2472_p9 = pnand %p1760_p7, %p2423_p0  ;;  %s2039_s15 = scalar_lea.vmem %s2394_s12, 1024 }
  0x4d   : > { %p2040_p3 = scmp.ne.s32.totalorder %s2394_s12, %s2039_s15  ;;  %p3082_p5 = pneg %p2364_p8 }
  0x4e   : > { %s2227_s1 = smov [#allocation10]  }
  0x4f   : > { %p2042_p2 = pnand %p2040_p3, %p3082_p5  ;;  %s2044_s25 = sshll.u32 %s2227_s1, 4  ;;  %s2045_s25 = int_to_ptr.vmem [resolvable:$false] %s2044_s25 }
  0x50   : > { %s2046_s16 = scalar_lea.vmem %s2045_s25, 2048  ;;  %p2047_p13 = scmp.lt.s32.totalorder %s2394_s12, %s2045_s25 }
  0x51   : > { %p2043_p1 = pneg %p2042_p2  ;;  %p2048_p4 = scmp.lt.s32.totalorder %s2046_s16, %s2039_s15 }
  0x53   : > { %p2049_p11 = por %p2048_p4, %p2047_p13 }
  0x55   : > { %p2050_p6 = pnand %p2049_p11, %p2043_p1 }
  0x57   : > { %2053 = shalt.err (!%p2050_p6)
}
  0x58   : > { %s3083_s22 = smov 4   ;;  %s3084_s18 = smov 64  }
  0x59   : > { %1755 = dma.hbm_to_vmem [thread:$0]  (!%p2364_p8), %s2373_s9, 1024, %s2394_s12, %s2375_s5, %s3084_s18, %s3084_s18, %s3083_s22  }
  0x5a   : > { %s3085_s4 = sand.u32 1, %s2194_s17   ;;  %p2056_p7 = pneg %p2472_p9 }
  0x5b   : > { %s172_s6 = scalar_lea.sflag [#allocation6], %s3085_s4  ;;  %s2067_s11 = scalar_lea.vmem %s2466_s27, 1024 }
  0x5c   : > { %p2068_p6 = scmp.ne.s32.totalorder %s2466_s27, %s2067_s11  ;;  %s2228_s19 = smov [#allocation5]  }
  0x5d   : > { %s2072_s20 = sshll.u32 %s2228_s19, 4  ;;  %s2073_s20 = int_to_ptr.vmem [resolvable:$false] %s2072_s20 }
  0x5e   : > { %p2070_p0 = pnand %p2068_p6, %p2056_p7  ;;  %s2074_s29 = scalar_lea.vmem %s2073_s20, 2048 }
  0x5f   : > { %p2075_p4 = scmp.lt.s32.totalorder %s2466_s27, %s2073_s20  ;;  %p2076_p3 = scmp.lt.s32.totalorder %s2074_s29, %s2067_s11 }
  0x60   : > { %p2071_p11 = pneg %p2070_p0 }
  0x61   : > { %p2077_p5 = por %p2076_p3, %p2075_p4 }
  0x63   : > { %p2078_p2 = pnand %p2077_p5, %p2071_p11 }
  0x65   : > { %2081 = shalt.err (!%p2078_p2)
}
  0x66   : > { %1749 = dma.hbm_to_vmem [thread:$0]  (!%p2472_p9), %s2464_s28, 1024, %s2466_s27, %s172_s6, %s3084_s18, %s3084_s18, %s3083_s22  }
  0x67   : > { %242 = sbr.rel (%p2390_p12) target bundleno = 1151 (0x47f), region = 32  ;;  %s3087_s9 = sld [smem:[#allocation17_spill]] (!%p2390_p12) }
  0x6d   : > { %s2507_s7 = sand.u32 1, %s3087_s9  }
  0x6e   : > { %s1606_s10 = sshll.u32 %s2507_s7, 6  ;;  %s245_s3 = scalar_lea.sflag [#allocation6], %s2507_s7 }
  0x6f   : > { %s2511_s8 = scalar_lea.vmem [#allocation5], %s1606_s10 }
  0x70   : > { %2161 = dma.done.wait (%p2412_p10), %s245_s3, 1024  }
  0x71   : > { %2163 = vsyncadd (%p2412_p10), %s245_s3, 4294966272  ;;  %s3089_s2 = sld [smem:[#allocation22_spill]] }
  0x72   : > { %s3090_s27 = sld [smem:[#allocation15_spill]] }
  0x73   : > { %s3091_s28 = sld [smem:[#allocation23_spill]] }
  0x77   : > { %s253_s15 = sand.u32 1, %s3089_s2  }
  0x78   : > { %s255_s1 = sand.u32 1, %s3090_s27   ;;  %s254_s16 = scalar_lea.sflag [#allocation9], %s253_s15 }
  0x79   : > { %s1607_s25 = sshll.u32 %s255_s1, 6  ;;  %p3092_p8 = scmp.ne.s32.totalorder %s3091_s28, 0 }
  0x7a   : > { %s2519_s22 = scalar_lea.vmem [#allocation8], %s1607_s25 }
  0x7b   : > { %2165 = dma.done.wait (%p3092_p8), %s254_s16, 2048  }
  0x7c   : > { %2167 = vsyncadd (%p3092_p8), %s254_s16, 4294965248  ;;  %s1609_s18 = sshll.u32 %s2507_s7, 7  ;;  %s2526_s4 = scalar_lea.vmem [#allocation10], %s1607_s25 }
  0x7d   : > { %s2528_s6 = scalar_lea.vmem [#allocation11], %s1609_s18  ;;  %s3093_s11 = sld [smem:[#allocation18_spill]] }
  0x83   : > { %p1610_p12 = scmp.ne.s32.totalorder %s3093_s11, 0 }
  0x85   : > { %307 = sbr.rel (%p1610_p12) target bundleno = 163 (0xa3), region = 48 }
  0x8a   : > { %vm308_vm0 = vcmask 7168   ;;  %v2229_v0 = vmov -inf   ;;  %v2230_v1 = vmov 0.0  }
  0x8b   : > { %309 = vst.msk [vmem:[#allocation2] sm:$0xff] %vm308_vm0, %v2229_v0  ;;  %310 = vst.msk [vmem:[#allocation2 + $0x8] sm:$0xff] %vm308_vm0, %v2229_v0 }
  0x8c   : > { %311 = vst.msk [vmem:[#allocation2 + $0x10] sm:$0xff] %vm308_vm0, %v2229_v0  ;;  %312 = vst.msk [vmem:[#allocation2 + $0x18] sm:$0xff] %vm308_vm0, %v2229_v0 }
  0x8d   : > { %313 = vst.msk [vmem:[#allocation2 + $0x20] sm:$0xff] %vm308_vm0, %v2229_v0  ;;  %314 = vst.msk [vmem:[#allocation2 + $0x28] sm:$0xff] %vm308_vm0, %v2229_v0 }
  0x8e   : > { %315 = vst.msk [vmem:[#allocation2 + $0x30] sm:$0xff] %vm308_vm0, %v2229_v0  ;;  %316 = vst.msk [vmem:[#allocation2 + $0x38] sm:$0xff] %vm308_vm0, %v2229_v0 }
  0x8f   : > { %317 = vst.msk [vmem:[#allocation2 + $0x40] sm:$0xff] %vm308_vm0, %v2229_v0  ;;  %318 = vst.msk [vmem:[#allocation2 + $0x48] sm:$0xff] %vm308_vm0, %v2229_v0 }
  0x90   : > { %319 = vst.msk [vmem:[#allocation2 + $0x50] sm:$0xff] %vm308_vm0, %v2229_v0  ;;  %320 = vst.msk [vmem:[#allocation2 + $0x58] sm:$0xff] %vm308_vm0, %v2229_v0 }
  0x91   : > { %321 = vst.msk [vmem:[#allocation2 + $0x60] sm:$0xff] %vm308_vm0, %v2229_v0  ;;  %322 = vst.msk [vmem:[#allocation2 + $0x68] sm:$0xff] %vm308_vm0, %v2229_v0 }
  0x92   : > { %323 = vst.msk [vmem:[#allocation2 + $0x70] sm:$0xff] %vm308_vm0, %v2229_v0  ;;  %324 = vst.msk [vmem:[#allocation2 + $0x78] sm:$0xff] %vm308_vm0, %v2229_v0 }
  0x93   : > { %325 = vst.msk [vmem:[#allocation3] sm:$0xff] %vm308_vm0, %v2230_v1  ;;  %326 = vst.msk [vmem:[#allocation3 + $0x8] sm:$0xff] %vm308_vm0, %v2230_v1 }
  0x94   : > { %327 = vst.msk [vmem:[#allocation3 + $0x10] sm:$0xff] %vm308_vm0, %v2230_v1  ;;  %328 = vst.msk [vmem:[#allocation3 + $0x18] sm:$0xff] %vm308_vm0, %v2230_v1 }
  0x95   : > { %329 = vst.msk [vmem:[#allocation3 + $0x20] sm:$0xff] %vm308_vm0, %v2230_v1  ;;  %330 = vst.msk [vmem:[#allocation3 + $0x28] sm:$0xff] %vm308_vm0, %v2230_v1 }
  0x96   : > { %331 = vst.msk [vmem:[#allocation3 + $0x30] sm:$0xff] %vm308_vm0, %v2230_v1  ;;  %332 = vst.msk [vmem:[#allocation3 + $0x38] sm:$0xff] %vm308_vm0, %v2230_v1 }
  0x97   : > { %333 = vst.msk [vmem:[#allocation3 + $0x40] sm:$0xff] %vm308_vm0, %v2230_v1  ;;  %334 = vst.msk [vmem:[#allocation3 + $0x48] sm:$0xff] %vm308_vm0, %v2230_v1 }
  0x98   : > { %335 = vst.msk [vmem:[#allocation3 + $0x50] sm:$0xff] %vm308_vm0, %v2230_v1  ;;  %336 = vst.msk [vmem:[#allocation3 + $0x58] sm:$0xff] %vm308_vm0, %v2230_v1 }
  0x99   : > { %337 = vst.msk [vmem:[#allocation3 + $0x60] sm:$0xff] %vm308_vm0, %v2230_v1  ;;  %338 = vst.msk [vmem:[#allocation3 + $0x68] sm:$0xff] %vm308_vm0, %v2230_v1 }
  0x9a   : > { %339 = vst.msk [vmem:[#allocation3 + $0x70] sm:$0xff] %vm308_vm0, %v2230_v1  ;;  %340 = vst.msk [vmem:[#allocation3 + $0x78] sm:$0xff] %vm308_vm0, %v2230_v1 }
  0x9b   : > { %341 = vst [vmem:[#allocation4 + $0x30] sm:$0xff] %v2230_v1  ;;  %342 = vst [vmem:[#allocation4] sm:$0xff] %v2230_v1 }
  0x9c   : > { %343 = vst [vmem:[#allocation4 + $0x58] sm:$0xff] %v2230_v1  ;;  %344 = vst [vmem:[#allocation4 + $0x18] sm:$0xff] %v2230_v1 }
  0x9d   : > { %345 = vst [vmem:[#allocation4 + $0x50] sm:$0xff] %v2230_v1  ;;  %346 = vst [vmem:[#allocation4 + $0x68] sm:$0xff] %v2230_v1 }
  0x9e   : > { %347 = vst [vmem:[#allocation4 + $0x8] sm:$0xff] %v2230_v1  ;;  %348 = vst [vmem:[#allocation4 + $0x48] sm:$0xff] %v2230_v1 }
  0x9f   : > { %349 = vst [vmem:[#allocation4 + $0x40] sm:$0xff] %v2230_v1  ;;  %350 = vst [vmem:[#allocation4 + $0x20] sm:$0xff] %v2230_v1 }
  0xa0   : > { %351 = vst [vmem:[#allocation4 + $0x10] sm:$0xff] %v2230_v1  ;;  %352 = vst [vmem:[#allocation4 + $0x38] sm:$0xff] %v2230_v1 }
  0xa1   : > { %353 = vst [vmem:[#allocation4 + $0x60] sm:$0xff] %v2230_v1  ;;  %354 = vst [vmem:[#allocation4 + $0x70] sm:$0xff] %v2230_v1 }
  0xa2   : > { %355 = vst [vmem:[#allocation4 + $0x78] sm:$0xff] %v2230_v1  ;;  %356 = vst [vmem:[#allocation4 + $0x28] sm:$0xff] %v2230_v1 }
  0xa3 PF: > { %v1876_v2 = vld [vmem:[%s2519_s22 + $0x38] sm:$0xff]   ;;  %v1877_v3 = vld [vmem:[%s2519_s22 + $0x30] sm:$0xff]   ;;  %v1878_v4 = vld [vmem:[%s2519_s22 + $0x28] sm:$0xff]   ;;  %v2231_v32 = vmov 0   ;;  %vm934_vm1 = vcmask 7168   ;;  %s3094_s19 = sld [smem:[#allocation18_spill]] }
  0xa4   : > { %1674 = vmatprep.subr.bf16.mxu0 %v1876_v2  ;;  %v1884_v5 = vld [vmem:[%s2511_s8] sm:$0xff]   ;;  %v1880_v7 = vld [vmem:[%s2519_s22 + $0x18] sm:$0xff]   ;;  %v1881_v8 = vld [vmem:[%s2519_s22 + $0x10] sm:$0xff]   ;;  %1875 = vset.pattern.permute.xlu1 %v2231_v32 }
  0xa5   : > { %1675 = vmatpush3.bf16.xpose.msra.mxu0 %v1876_v2  ;;  %1690 = vmatprep.mubr.bf16.mxu0 %v1884_v5  ;;  %v1879_v6 = vld [vmem:[%s2519_s22 + $0x20] sm:$0xff]   ;;  %v1882_v9 = vld [vmem:[%s2519_s22 + $0x8] sm:$0xff]   ;;  %v1886_v12 = vld [vmem:[%s2511_s8 + $0x10] sm:$0xff]  }
  0xa6   : > { %1676 = vmatprep.subr.bf16.mxu0 %v1877_v3  ;;  %v1883_v10 = vld [vmem:[%s2519_s22] sm:$0xff]   ;;  %v1885_v11 = vld [vmem:[%s2511_s8 + $0x8] sm:$0xff]   ;;  %v1887_v13 = vld [vmem:[%s2511_s8 + $0x18] sm:$0xff]   ;;  %1874 = vset.pattern.permute.xlu0 %v2231_v32 }
  0xa7   : > { %v1888_v14 = vld [vmem:[%s2511_s8 + $0x20] sm:$0xff]   ;;  %v1889_v15 = vld [vmem:[%s2511_s8 + $0x28] sm:$0xff]   ;;  %v1890_v16 = vld [vmem:[%s2511_s8 + $0x30] sm:$0xff]  }
  0xa8   : > { %v1891_v17 = vld [vmem:[%s2511_s8 + $0x38] sm:$0xff]   ;;  %v2628_v52 = vld [vmem:[#allocation2 + $0x10] sm:$0xff]  ;;  %v2631_v55 = vld [vmem:[#allocation2] sm:$0xff] }
  0xa9   : > { %v1892_v51 = vld [vmem:[%s2526_s4 + $0x38] sm:$0xff]   ;;  %v1893_v53 = vld [vmem:[%s2526_s4 + $0x30] sm:$0xff]   ;;  %v1894_v59 = vld [vmem:[%s2526_s4 + $0x28] sm:$0xff]   ;;  %p1635_p10 = scmp.ne.s32.totalorder %s3094_s19, 1 }
  0xaa   : > { %1706 = vmatprep.subr.bf16.mxu1 %v1892_v51  ;;  %v2636_v58 = vld [vmem:[#allocation2 + $0x18] sm:$0xff]  ;;  %v2645_v62 = vld [vmem:[#allocation2 + $0x8] sm:$0xff]  ;;  %v1895_v1 = vld [vmem:[%s2526_s4 + $0x20] sm:$0xff]  }
  0xab   : > { %1707 = vmatpush3.bf16.msra.mxu1 %v1892_v51  ;;  %v2664_v5 = vld [vmem:[#allocation2 + $0x38] sm:$0xff] }
  0xac   : > { %1708 = vmatprep.subr.bf16.mxu1 %v1893_v53 }
  0xad   : > { %1677 = vmatpush3.bf16.xpose.msra.mxu0 %v1877_v3  ;;  %v2660_v3 = vld [vmem:[#allocation2 + $0x20] sm:$0xff] }
  0xae   : > { %1678 = vmatprep.subr.bf16.mxu0 %v1878_v4 }
  0xaf   : > { %1709 = vmatpush3.bf16.msra.mxu1 %v1893_v53  ;;  %v2725_v53 = vld [vmem:[#allocation2 + $0x78] sm:$0xff] }
  0xb0   : > { %1710 = vmatprep.subr.bf16.mxu1 %v1894_v59 }
  0xb3   : > { %1711 = vmatpush3.bf16.msra.mxu1 %v1894_v59  ;;  %v2733_v59 = vld [vmem:[#allocation2 + $0x70] sm:$0xff] }
  0xb4   : > { %1712 = vmatprep.subr.bf16.mxu1 %v1895_v1 }
  0xb5   : > { %1679 = vmatpush3.bf16.xpose.msra.mxu0 %v1878_v4 }
  0xb6   : > { %1680 = vmatprep.subr.bf16.mxu0 %v1879_v6 }
  0xb7   : > { %1713 = vmatpush3.bf16.msra.mxu1 %v1895_v1 }
  0xbd   : > { %1681 = vmatpush3.bf16.xpose.msra.mxu0 %v1879_v6  ;;  %v1896_v6 = vld [vmem:[%s2526_s4 + $0x18] sm:$0xff]  }
  0xbe   : > { %1682 = vmatprep.subr.bf16.mxu0 %v1880_v7  ;;  %1714 = vmatprep.subr.bf16.mxu1 %v1896_v6 }
  0xbf   : > { %1715 = vmatpush3.bf16.msra.mxu1 %v1896_v6 }
  0xc5   : > { %1683 = vmatpush3.bf16.xpose.msra.mxu0 %v1880_v7 }
  0xc6   : > { %1684 = vmatprep.subr.bf16.mxu0 %v1881_v8 }
  0xcd   : > { %1685 = vmatpush3.bf16.xpose.msra.mxu0 %v1881_v8 }
  0xce   : > { %1686 = vmatprep.subr.bf16.mxu0 %v1882_v9 }
  0xd5   : > { %1687 = vmatpush3.bf16.xpose.msra.mxu0 %v1882_v9  ;;  %v2671_v9 = vld [vmem:[#allocation2 + $0x30] sm:$0xff] }
  0xd6   : > { %1688 = vmatprep.subr.bf16.mxu0 %v1883_v10 }
  0xdd   : > { %1689 = vmatpush3.bf16.xpose.msra.mxu0 %v1883_v10 }
  0xe4   : > { %1691 = vmatmul.mubr.bf16.vlgmr.msra.gmra.mxu0 %v1885_v11 }
  0xe5   : > { %1694 = vmatprep.mubr.bf16.mxu0 %v1886_v12  ;;  %v2678_v12 = vld [vmem:[#allocation2 + $0x28] sm:$0xff] }
  0xec   : > { %1695 = vmatmul.mubr.bf16.gmra.mxu0 %v1887_v13  ;;  %v1897_v13 = vld [vmem:[%s2526_s4 + $0x10] sm:$0xff]  }
  0xed   : > { %1698 = vmatprep.mubr.bf16.mxu0 %v1888_v14  ;;  %1716 = vmatprep.subr.bf16.mxu1 %v1897_v13 }
  0xee   : > { %1717 = vmatpush3.bf16.msra.mxu1 %v1897_v13 }
  0xf4   : > { %1699 = vmatmul.mubr.bf16.gmra.mxu0 %v1889_v15 }
  0xf5   : > { %1702 = vmatprep.mubr.bf16.mxu0 %v1890_v16  ;;  %v2686_v16 = vld [vmem:[#allocation2 + $0x40] sm:$0xff] }
  0xfc   : > { %1703 = vmatmul.mubr.bf16.gmra.mxu0 %v1891_v17 }
 0x1a4   : > { %v1692_v18 = vpop.f32.mrf.mxu0 }
 0x1a5   : > { %v2579_v19 = vmul.f32 0.088388346, %v1692_v18 }
 0x1a6   : > { %v535_v20 = vpop.f32.mrf.mxu0 }
 0x1a7   : > { %v2581_v21 = vmul.f32 0.088388346, %v535_v20  ;;  %634 = vmax.xlane.f32.xlu1 %v2579_v19  ;;  %v2694_v20 = vld [vmem:[#allocation2 + $0x58] sm:$0xff] }
 0x1a8   : > { %v1693_v22 = vpop.f32.mrf.mxu0 }
 0x1a9   : > { %v2584_v23 = vmul.f32 0.088388346, %v1693_v22  ;;  %630 = vmax.xlane.f32.xlu0 %v2581_v21  ;;  %v1898_v22 = vld [vmem:[%s2526_s4 + $0x8] sm:$0xff]  }
 0x1aa   : > { %v538_v24 = vpop.f32.mrf.mxu0  ;;  %1718 = vmatprep.subr.bf16.mxu1 %v1898_v22 }
 0x1ab   : > { %v2587_v25 = vmul.f32 0.088388346, %v538_v24  ;;  %636 = vmax.xlane.f32.xlu1 %v2584_v23  ;;  %1719 = vmatpush3.bf16.msra.mxu1 %v1898_v22 }
 0x1ac   : > { %v1696_v26 = vpop.f32.mrf.mxu0 }
 0x1ad   : > { %632 = vmax.xlane.f32.xlu0 %v2587_v25  ;;  %v2596_v33 = vmul.f32 0.088388346, %v1696_v26 }
 0x1ae   : > { %v551_v27 = vpop.f32.mrf.mxu0 }
 0x1af   : > { %v2591_v28 = vmul.f32 0.088388346, %v551_v27  ;;  %v2702_v27 = vld [vmem:[#allocation2 + $0x50] sm:$0xff] }
 0x1b0   : > { %v1697_v29 = vpop.f32.mrf.mxu0 }
 0x1b1   : > { %v2593_v30 = vmul.f32 0.088388346, %v1697_v29  ;;  %638 = vmax.xlane.f32.xlu0 %v2591_v28 }
 0x1b2   : > { %v554_v31 = vpop.f32.mrf.mxu0 }
 0x1b3   : > { %644 = vmax.xlane.f32.xlu1 %v2593_v30  ;;  %v2599_v35 = vmul.f32 0.088388346, %v554_v31 }
 0x1b4   : > { %v1700_v34 = vpop.f32.mrf.mxu0 }
 0x1b5   : > { %642 = vmax.xlane.f32.xlu0 %v2596_v33  ;;  %v2605_v39 = vmul.f32 0.088388346, %v1700_v34  ;;  %v2710_v34 = vld [vmem:[#allocation2 + $0x48] sm:$0xff] }
 0x1b6   : > { %v567_v36 = vpop.f32.mrf.mxu0 }
 0x1b7   : > { %v2602_v37 = vmul.f32 0.088388346, %v567_v36  ;;  %640 = vmax.xlane.f32.xlu1 %v2599_v35  ;;  %v1899_v36 = vld [vmem:[%s2526_s4] sm:$0xff]  }
 0x1b8   : > { %v1701_v38 = vpop.f32.mrf.mxu0  ;;  %1720 = vmatprep.subr.bf16.mxu1 %v1899_v36 }
 0x1b9   : > { %v2607_v40 = vmul.f32 0.088388346, %v1701_v38  ;;  %646 = vmax.xlane.f32.xlu0 %v2602_v37  ;;  %1721 = vmatpush3.bf16.msra.mxu1 %v1899_v36 }
 0x1ba   : > { %v570_v41 = vpop.f32.mrf.mxu0 }
 0x1bb   : > { %652 = vmax.xlane.f32.xlu1 %v2607_v40  ;;  %v2611_v43 = vmul.f32 0.088388346, %v570_v41 }
 0x1bc   : > { %v1704_v42 = vpop.f32.mrf.mxu0 }
 0x1bd   : > { %650 = vmax.xlane.f32.xlu0 %v2605_v39  ;;  %v2617_v47 = vmul.f32 0.088388346, %v1704_v42 }
 0x1be   : > { %v583_v44 = vpop.f32.mrf.mxu0 }
 0x1bf   : > { %v2614_v45 = vmul.f32 0.088388346, %v583_v44  ;;  %648 = vmax.xlane.f32.xlu1 %v2611_v43  ;;  %v2719_v44 = vld [vmem:[#allocation2 + $0x60] sm:$0xff] }
 0x1c0   : > { %v1705_v46 = vpop.f32.mrf.mxu0 }
 0x1c1   : > { %v2619_v48 = vmul.f32 0.088388346, %v1705_v46  ;;  %654 = vmax.xlane.f32.xlu0 %v2614_v45 }
 0x1c2   : > { %v586_v49 = vpop.f32.mrf.mxu0 }
 0x1c3   : > { %660 = vmax.xlane.f32.xlu1 %v2619_v48  ;;  %v2623_v50 = vmul.f32 0.088388346, %v586_v49 }
 0x1c5   : > { %658 = vmax.xlane.f32.xlu0 %v2617_v47 }
 0x1c7   : > { %656 = vmax.xlane.f32.xlu1 %v2623_v50 }
 0x230   : > { %v635_v54 = vpop.xlane.xlu1 %634 }
 0x231   : > { %v2634_v56 = vmax.f32 %v2628_v52, %v635_v54 }
 0x232   : > { %v631_v57 = vpop.xlane.xlu0 %630 }
 0x233   : > { %1250 = vst.msk [vmem:[#allocation2 + $0x10] sm:$0xff] %vm934_vm1, %v2634_v56  ;;  %v2642_v60 = vmax.f32 %v2631_v55, %v631_v57  ;;  %738 = vperm.xlu1 %1875, %v2634_v56  }
 0x234   : > { %v637_v61 = vpop.xlane.xlu1 %636 }
 0x235   : > { %1248 = vst.msk [vmem:[#allocation2] sm:$0xff] %vm934_vm1, %v2642_v60  ;;  %v2650_v63 = vmax.f32 %v2636_v58, %v637_v61  ;;  %728 = vperm.xlu0 %1874, %v2642_v60   ;;  %v678_v29 = vsub.f32 %v2631_v55, %v2642_v60 }
 0x236   : > { %v633_v0 = vpop.xlane.xlu0 %632 }
 0x237   : > { %1251 = vst.msk [vmem:[#allocation2 + $0x18] sm:$0xff] %vm934_vm1, %v2650_v63  ;;  %v2657_v2 = vmax.f32 %v2645_v62, %v633_v0  ;;  %743 = vperm.xlu1 %1875, %v2650_v63   ;;  %v681_v41 = vsub.f32 %v2636_v58, %v2650_v63  ;;  %v694_v46 = vmul.f32 1.442695, %v678_v29  ;;  %v627_v63 = vld [vmem:[#allocation2 + $0x68] sm:$0xff]  ;;  %v680_v0 = vsub.f32 %v2628_v52, %v2634_v56 }
 0x239   : > { %1249 = vst.msk [vmem:[#allocation2 + $0x8] sm:$0xff] %vm934_vm1, %v2657_v2  ;;  %v679_v54 = vsub.f32 %v2645_v62, %v2657_v2  ;;  %v700_v57 = vmul.f32 1.442695, %v681_v41  ;;  %1900 = vpow2.f32 %v694_v46 }
 0x23a   : > { %v639_v4 = vpop.xlane.xlu0 %638 }
 0x23b   : > { %v2668_v7 = vmax.f32 %v2660_v3, %v639_v4  ;;  %733 = vperm.xlu1 %1875, %v2657_v2   ;;  %v696_v1 = vmul.f32 1.442695, %v679_v54  ;;  %1902 = vpow2.f32 %v700_v57 }
 0x23c   : > { %v645_v8 = vpop.xlane.xlu1 %644 }
 0x23d   : > { %1252 = vst.msk [vmem:[#allocation2 + $0x20] sm:$0xff] %vm934_vm1, %v2668_v7  ;;  %v2676_v10 = vmax.f32 %v2664_v5, %v645_v8  ;;  %1904 = vpow2.f32 %v696_v1 }
 0x23e   : > { %v643_v11 = vpop.xlane.xlu0 %642 }
 0x23f   : > { %1255 = vst.msk [vmem:[#allocation2 + $0x38] sm:$0xff] %vm934_vm1, %v2676_v10  ;;  %v2684_v14 = vmax.f32 %v2671_v9, %v643_v11  ;;  %v685_v60 = vsub.f32 %v2664_v5, %v2676_v10  ;;  %v682_v11 = vsub.f32 %v2660_v3, %v2668_v7 }
 0x240   : > { %v641_v15 = vpop.xlane.xlu1 %640 }
 0x241   : > { %1254 = vst.msk [vmem:[#allocation2 + $0x30] sm:$0xff] %vm934_vm1, %v2684_v14  ;;  %v2691_v17 = vmax.f32 %v2678_v12, %v641_v15  ;;  %758 = vperm.xlu1 %1875, %v2684_v14   ;;  %v708_v6 = vmul.f32 1.442695, %v685_v60  ;;  %v702_v15 = vmul.f32 1.442695, %v682_v11 }
 0x242   : > { %v647_v18 = vpop.xlane.xlu0 %646 }
 0x243   : > { %1253 = vst.msk [vmem:[#allocation2 + $0x28] sm:$0xff] %vm934_vm1, %v2691_v17  ;;  %v2700_v24 = vmax.f32 %v2686_v16, %v647_v18  ;;  %v683_v8 = vsub.f32 %v2678_v12, %v2691_v17  ;;  %1906 = vpow2.f32 %v708_v6 }
 0x244   : > { %v653_v26 = vpop.xlane.xlu1 %652 }
 0x245   : > { %1256 = vst.msk [vmem:[#allocation2 + $0x40] sm:$0xff] %vm934_vm1, %v2700_v24  ;;  %v673_v31 = vmax.f32 %v2694_v20, %v653_v26  ;;  %748 = vperm.xlu1 %1875, %v2668_v7   ;;  %v704_v13 = vmul.f32 1.442695, %v683_v8  ;;  %v686_v29 = vsub.f32 %v2686_v16, %v2700_v24 }
 0x246   : > { %v651_v32 = vpop.xlane.xlu0 %650  ;;  %v2769_v7 = vpop.eup %1900 }
 0x247   : > { %1259 = vst.msk [vmem:[#allocation2 + $0x58] sm:$0xff] %vm934_vm1, %v673_v31  ;;  %v2715_v38 = vmax.f32 %v2702_v27, %v651_v32  ;;  %v689_v12 = vsub.f32 %v2694_v20, %v673_v31  ;;  %v710_v36 = vmul.f32 1.442695, %v686_v29 }
 0x248   : > { %v649_v42 = vpop.xlane.xlu1 %648  ;;  %v2774_v26 = vpop.eup %1902 }
 0x249   : > { %1258 = vst.msk [vmem:[#allocation2 + $0x50] sm:$0xff] %vm934_vm1, %v2715_v38  ;;  %v671_v49 = vmax.f32 %v2710_v34, %v649_v42  ;;  %753 = vperm.xlu1 %1875, %v2691_v17   ;;  %v684_v17 = vsub.f32 %v2671_v9, %v2684_v14  ;;  %v716_v18 = vmul.f32 1.442695, %v689_v12  ;;  %v688_v20 = vsub.f32 %v2702_v27, %v2715_v38 }
 0x24a   : > { %v655_v51 = vpop.xlane.xlu0 %654  ;;  %v2780_v32 = vpop.eup %1904 }
 0x24b   : > { %1257 = vst.msk [vmem:[#allocation2 + $0x48] sm:$0xff] %vm934_vm1, %v671_v49  ;;  %v2731_v55 = vmax.f32 %v2719_v44, %v655_v51  ;;  %773 = vperm.xlu0 %1874, %v671_v49   ;;  %v687_v3 = vsub.f32 %v2710_v34, %v671_v49  ;;  %v706_v22 = vmul.f32 1.442695, %v684_v17 }
 0x24c   : > { %v661_v58 = vpop.xlane.xlu1 %660 }
 0x24d   : > { %1260 = vst.msk [vmem:[#allocation2 + $0x60] sm:$0xff] %vm934_vm1, %v2731_v55  ;;  %v2740_v61 = vmax.f32 %v2725_v53, %v661_v58  ;;  %763 = vperm.xlu1 %1875, %v2676_v10   ;;  %v698_v10 = vmul.f32 1.442695, %v680_v0  ;;  %v712_v9 = vmul.f32 1.442695, %v687_v3 }
 0x24e   : > { %v659_v62 = vpop.xlane.xlu0 %658 }
 0x24f   : > { %v693_v2 = vsub.f32 %v2725_v53, %v2740_v61  ;;  %1263 = vst.msk [vmem:[#allocation2 + $0x78] sm:$0xff] %vm934_vm1, %v2740_v61  ;;  %v2750_v4 = vmax.f32 %v2733_v59, %v659_v62  ;;  %783 = vperm.xlu0 %1874, %v673_v31   ;;  %1908 = vpow2.f32 %v698_v10  ;;  %v714_v31 = vmul.f32 1.442695, %v688_v20 }
 0x250   : > { %v657_v5 = vpop.xlane.xlu1 %656  ;;  %1910 = vpow2.f32 %v704_v13  ;;  %v2783_v34 = vpop.eup %1906 }
 0x251   : > { %v692_v52 = vsub.f32 %v2733_v59, %v2750_v4  ;;  %1262 = vst.msk [vmem:[#allocation2 + $0x70] sm:$0xff] %vm934_vm1, %v2750_v4  ;;  %v675_v56 = vmax.f32 %v627_v63, %v657_v5  ;;  %768 = vperm.xlu1 %1875, %v2700_v24   ;;  %1912 = vpow2.f32 %v702_v15 }
 0x252   : > { %1914 = vpow2.f32 %v716_v18 }
 0x253   : > { %1261 = vst.msk [vmem:[#allocation2 + $0x68] sm:$0xff] %vm934_vm1, %v675_v56  ;;  %793 = vperm.xlu0 %1874, %v675_v56   ;;  %v691_v14 = vsub.f32 %v627_v63, %v675_v56  ;;  %1916 = vpow2.f32 %v706_v22 }
 0x254   : > { %1918 = vpow2.f32 %v712_v9 }
 0x255   : > { %778 = vperm.xlu1 %1875, %v2715_v38   ;;  %v720_v27 = vmul.f32 1.442695, %v691_v14  ;;  %1920 = vpow2.f32 %v714_v31  ;;  %v690_v38 = vsub.f32 %v2719_v44, %v2731_v55 }
 0x257   : > { %803 = vperm.xlu0 %1874, %v2740_v61   ;;  %1922 = vpow2.f32 %v720_v27  ;;  %v718_v24 = vmul.f32 1.442695, %v690_v38 }
 0x258   : > { %1924 = vpow2.f32 %v710_v36 }
 0x259   : > { %788 = vperm.xlu1 %1875, %v2731_v55   ;;  %1926 = vpow2.f32 %v718_v24 }
 0x25b   : > { %969 = vperm.xlu0 %1874, %v2769_v7  }
 0x25c   : > { %v2788_v41 = vpop.eup %1908 }
 0x25d   : > { %798 = vperm.xlu1 %1875, %v2750_v4   ;;  %v2791_v16 = vpop.eup %1910 }
 0x25e   : > { %v2794_v42 = vpop.eup %1912 }
 0x25f   : > { %984 = vperm.xlu0 %1874, %v2774_v26   ;;  %v2797_v46 = vpop.eup %1914 }
 0x260   : > { %v2800_v44 = vpop.eup %1916 }
 0x261   : > { %974 = vperm.xlu1 %1875, %v2780_v32   ;;  %v2803_v49 = vpop.eup %1918 }
 0x262   : > { %v2806_v51 = vpop.eup %1920 }
 0x263   : > { %1004 = vperm.xlu0 %1874, %v2783_v34  }
 0x264   : > { %v2809_v54 = vpop.eup %1922 }
 0x265   : > { %979 = vperm.xlu1 %1875, %v2788_v41   ;;  %v2812_v55 = vpop.eup %1924 }
 0x266   : > { %v2815_v57 = vpop.eup %1926 }
 0x267   : > { %994 = vperm.xlu0 %1874, %v2791_v16  }
 0x269   : > { %989 = vperm.xlu1 %1875, %v2794_v42  }
 0x26b   : > { %1024 = vperm.xlu0 %1874, %v2797_v46  }
 0x26d   : > { %999 = vperm.xlu1 %1875, %v2800_v44  }
 0x26f   : > { %1014 = vperm.xlu0 %1874, %v2803_v49  }
 0x271   : > { %1019 = vperm.xlu1 %1875, %v2806_v51  }
 0x273   : > { %1034 = vperm.xlu0 %1874, %v2809_v54  }
 0x275   : > { %1009 = vperm.xlu1 %1875, %v2812_v55  }
 0x279   : > { %1029 = vperm.xlu1 %1875, %v2815_v57  }
 0x2ae   : > { %v739_v58 = vpop.permute.xlu1 %738 }
 0x2af   : > { %v808_v60 = vsub.f32 %v2579_v19, %v739_v58 }
 0x2b0   : > { %v729_v62 = vpop.permute.xlu0 %728 }
 0x2b1   : > { %v826_v63 = vmul.f32 1.442695, %v808_v60  ;;  %v806_v0 = vsub.f32 %v2581_v21, %v729_v62 }
 0x2b2   : > { %v744_v1 = vpop.permute.xlu1 %743 }
 0x2b3   : > { %1928 = vpow2.f32 %v826_v63  ;;  %v822_v5 = vmul.f32 1.442695, %v806_v0  ;;  %v809_v6 = vsub.f32 %v2584_v23, %v744_v1 }
 0x2b5   : > { %1930 = vpow2.f32 %v822_v5  ;;  %v828_v8 = vmul.f32 1.442695, %v809_v6 }
 0x2b6   : > { %v734_v56 = vpop.permute.xlu1 %733 }
 0x2b7   : > { %v807_v10 = vsub.f32 %v2587_v25, %v734_v56  ;;  %1932 = vpow2.f32 %v828_v8 }
 0x2b9   : > { %v824_v11 = vmul.f32 1.442695, %v807_v10 }
 0x2bb   : > { %1934 = vpow2.f32 %v824_v11 }
 0x2bc   : > { %v759_v13 = vpop.permute.xlu1 %758 }
 0x2bd   : > { %v812_v19 = vsub.f32 %v2596_v33, %v759_v13 }
 0x2bf   : > { %v834_v12 = vmul.f32 1.442695, %v812_v19 }
 0x2c0   : > { %v1929_v15 = vpop.eup %1928  ;;  %v749_v17 = vpop.permute.xlu1 %748 }
 0x2c1   : > { %1936 = vpow2.f32 %v834_v12  ;;  %v810_v21 = vsub.f32 %v2591_v28, %v749_v17  ;;  %890 = vadd.xlane.f32.xlu0 %v1929_v15 }
 0x2c2   : > { %v1931_v18 = vpop.eup %1930 }
 0x2c3   : > { %v830_v23 = vmul.f32 1.442695, %v810_v21  ;;  %886 = vadd.xlane.f32.xlu1 %v1931_v18 }
 0x2c4   : > { %v754_v3 = vpop.permute.xlu1 %753  ;;  %v1933_v22 = vpop.eup %1932 }
 0x2c5   : > { %1938 = vpow2.f32 %v830_v23  ;;  %v811_v25 = vsub.f32 %v2599_v35, %v754_v3  ;;  %v1064_v36 = vpack.c.bf16 %v1933_v22, %v1929_v15 }
 0x2c6   : > { %v774_v20 = vpop.permute.xlu0 %773 }
 0x2c7   : > { %v832_v9 = vmul.f32 1.442695, %v811_v25  ;;  %892 = vadd.xlane.f32.xlu1 %v1933_v22  ;;  %v815_v33 = vsub.f32 %v2611_v43, %v774_v20 }
 0x2c8   : > { %v1935_v14 = vpop.eup %1934  ;;  %v764_v29 = vpop.permute.xlu1 %763 }
 0x2c9   : > { %1940 = vpow2.f32 %v832_v9  ;;  %v813_v31 = vsub.f32 %v2593_v30, %v764_v29  ;;  %888 = vadd.xlane.f32.xlu0 %v1935_v14  ;;  %v1063_v28 = vpack.c.bf16 %v1935_v14, %v1931_v18  ;;  %v840_v24 = vmul.f32 1.442695, %v815_v33 }
 0x2ca   : > { %v784_v27 = vpop.permute.xlu0 %783 }
 0x2cb   : > { %v836_v38 = vmul.f32 1.442695, %v813_v31  ;;  %1722 = vmatprep.mubr.bf16.mxu1 %v1063_v28  ;;  %v817_v35 = vsub.f32 %v2607_v40, %v784_v27  ;;  %v722_v31 = vmul.f32 1.442695, %v692_v52  ;;  %v724_v28 = vmul.f32 1.442695, %v693_v2 }
 0x2cc   : > { %1723 = vmatmul.mubr.bf16.vlgmr.msra.gmra.mxu1 %v1064_v36  ;;  %v769_v58 = vpop.permute.xlu1 %768 }
 0x2cd   : > { %1942 = vpow2.f32 %v836_v38  ;;  %v814_v60 = vsub.f32 %v2602_v37, %v769_v58  ;;  %v844_v30 = vmul.f32 1.442695, %v817_v35 }
 0x2ce   : > { %v1937_v62 = vpop.eup %1936  ;;  %v794_v43 = vpop.permute.xlu0 %793  ;;  %1944 = vpow2.f32 %v840_v24 }
 0x2cf   : > { %v838_v63 = vmul.f32 1.442695, %v814_v60  ;;  %898 = vadd.xlane.f32.xlu0 %v1937_v62  ;;  %v819_v0 = vsub.f32 %v2623_v50, %v794_v43 }
 0x2d0   : > { %v779_v1 = vpop.permute.xlu1 %778 }
 0x2d1   : > { %1946 = vpow2.f32 %v838_v63  ;;  %v816_v5 = vsub.f32 %v2605_v39, %v779_v1  ;;  %v848_v56 = vmul.f32 1.442695, %v819_v0  ;;  %v856_v63 = vld [vmem:[#allocation3 + $0x10] sm:$0xff]  ;;  %v854_v0 = vld [vmem:[#allocation3] sm:$0xff] }
 0x2d2   : > { %v1939_v6 = vpop.eup %1938  ;;  %v804_v8 = vpop.permute.xlu0 %803  ;;  %1948 = vpow2.f32 %v844_v30  ;;  %v872_v1 = vmul.f32 %v2788_v41, %v856_v63 }
 0x2d3   : > { %v842_v40 = vmul.f32 1.442695, %v816_v5  ;;  %894 = vadd.xlane.f32.xlu0 %v1939_v6  ;;  %v821_v37 = vsub.f32 %v2619_v48, %v804_v8  ;;  %v870_v8 = vmul.f32 %v2769_v7, %v854_v0 }
 0x2d4   : > { %v789_v10 = vpop.permute.xlu1 %788 }
 0x2d5   : > { %1950 = vpow2.f32 %v842_v40  ;;  %v818_v11 = vsub.f32 %v2614_v45, %v789_v10  ;;  %v852_v50 = vmul.f32 1.442695, %v821_v37  ;;  %v855_v10 = vld [vmem:[#allocation3 + $0x8] sm:$0xff] }
 0x2d6   : > { %v1941_v13 = vpop.eup %1940  ;;  %1952 = vpow2.f32 %v848_v56  ;;  %v2846_v38 = vpop.permute.xlu0 %969  ;;  %v857_v56 = vld [vmem:[#allocation3 + $0x18] sm:$0xff] }
 0x2d7   : > { %v846_v19 = vmul.f32 1.442695, %v818_v11  ;;  %v1065_v12 = vpack.c.bf16 %v1941_v13, %v1939_v6  ;;  %v873_v11 = vmul.f32 %v2774_v26, %v857_v56 }
 0x2d8   : > { %v799_v15 = vpop.permute.xlu1 %798 }
 0x2d9   : > { %1954 = vpow2.f32 %v846_v19  ;;  %v820_v39 = vsub.f32 %v2617_v47, %v799_v15  ;;  %1726 = vmatprep.mubr.bf16.mxu1 %v1065_v12  ;;  %v871_v12 = vmul.f32 %v2780_v32, %v855_v10  ;;  %v860_v15 = vld [vmem:[#allocation3 + $0x30] sm:$0xff]  ;;  %v861_v32 = vld [vmem:[#allocation3 + $0x38] sm:$0xff] }
 0x2da   : > { %v1943_v17 = vpop.eup %1942  ;;  %1956 = vpow2.f32 %v852_v50  ;;  %v2850_v4 = vpop.permute.xlu0 %984  ;;  %v876_v7 = vmul.f32 %v2800_v44, %v860_v15 }
 0x2db   : > { %v850_v21 = vmul.f32 1.442695, %v820_v39  ;;  %900 = vadd.xlane.f32.xlu1 %v1943_v17  ;;  %v1066_v18 = vpack.c.bf16 %v1943_v17, %v1937_v62  ;;  %v1945_v48 = vpop.eup %1944  ;;  %v858_v17 = vld [vmem:[#allocation3 + $0x20] sm:$0xff] }
 0x2dc   : > { %v2848_v59 = vpop.permute.xlu1 %974  ;;  %v874_v26 = vmul.f32 %v2794_v42, %v858_v17  ;;  %v954_v17 = vld [vmem:[#allocation4 + $0x18] sm:$0xff] }
 0x2dd   : > { %1958 = vpow2.f32 %v850_v21  ;;  %1727 = vmatmul.mubr.bf16.gmra.mxu1 %v1066_v18 }
 0x2de   : > { %v1947_v23 = vpop.eup %1946  ;;  %1960 = vpow2.f32 %v722_v31  ;;  %v2854_v24 = vpop.permute.xlu0 %1004  ;;  %v863_v31 = vld [vmem:[#allocation3 + $0x48] sm:$0xff] }
 0x2df   : > { %896 = vadd.xlane.f32.xlu1 %v1941_v13  ;;  %v1067_v45 = vpack.c.bf16 %v1945_v48, %v1947_v23  ;;  %v1949_v3 = vpop.eup %1948  ;;  %1962 = vpow2.f32 %v724_v28  ;;  %v879_v0 = vmul.f32 %v2803_v49, %v863_v31 }
 0x2e0   : > { %v2852_v52 = vpop.permute.xlu1 %979 }
 0x2e1   : > { %1730 = vmatprep.mubr.bf16.mxu1 %v1067_v45 }
 0x2e2   : > { %v1951_v25 = vpop.eup %1950  ;;  %v2858_v61 = vpop.permute.xlu0 %994 }
 0x2e3   : > { %908 = vadd.xlane.f32.xlu1 %v1949_v3  ;;  %906 = vadd.xlane.f32.xlu0 %v1951_v25  ;;  %v1068_v22 = vpack.c.bf16 %v1949_v3, %v1951_v25  ;;  %v1953_v20 = vpop.eup %1952  ;;  %v859_v3 = vld [vmem:[#allocation3 + $0x28] sm:$0xff] }
 0x2e4   : > { %v2856_v53 = vpop.permute.xlu1 %989  ;;  %v875_v44 = vmul.f32 %v2791_v16, %v859_v3 }
 0x2e5   : > { %1731 = vmatmul.mubr.bf16.gmra.mxu1 %v1068_v22 }
 0x2e6   : > { %v1955_v47 = vpop.eup %1954  ;;  %v2862_v35 = vpop.permute.xlu0 %1024 }
 0x2e7   : > { %904 = vadd.xlane.f32.xlu1 %v1945_v48  ;;  %902 = vadd.xlane.f32.xlu0 %v1947_v23  ;;  %v1069_v9 = vpack.c.bf16 %v1953_v20, %v1955_v47  ;;  %v1957_v14 = vpop.eup %1956  ;;  %v877_v23 = vmul.f32 %v2783_v34, %v861_v32  ;;  %v862_v34 = vld [vmem:[#allocation3 + $0x40] sm:$0xff] }
 0x2e8   : > { %v2860_v2 = vpop.permute.xlu1 %999  ;;  %v878_v16 = vmul.f32 %v2812_v55, %v862_v34  ;;  %v867_v55 = vld [vmem:[#allocation3 + $0x68] sm:$0xff] }
 0x2e9   : > { %1734 = vmatprep.mubr.bf16.mxu1 %v1069_v9 }
 0x2ea   : > { %v1959_v33 = vpop.eup %1958  ;;  %v2866_v60 = vpop.permute.xlu0 %1014 }
 0x2eb   : > { %916 = vadd.xlane.f32.xlu1 %v1957_v14  ;;  %914 = vadd.xlane.f32.xlu0 %v1959_v33  ;;  %v1070_v29 = vpack.c.bf16 %v1957_v14, %v1959_v33  ;;  %v2840_v27 = vpop.eup %1960 }
 0x2ec   : > { %v2843_v36 = vpop.eup %1962  ;;  %v2864_v58 = vpop.permute.xlu1 %1019 }
 0x2ed   : > { %1735 = vmatmul.mubr.bf16.gmra.mxu1 %v1070_v29 }
 0x2ee   : > { %v2870_v43 = vpop.permute.xlu0 %1034 }
 0x2ef   : > { %912 = vadd.xlane.f32.xlu1 %v1953_v20  ;;  %910 = vadd.xlane.f32.xlu0 %v1955_v47  ;;  %v864_v20 = vld [vmem:[#allocation3 + $0x50] sm:$0xff]  ;;  %v865_v47 = vld [vmem:[#allocation3 + $0x58] sm:$0xff] }
 0x2f0   : > { %v2868_v62 = vpop.permute.xlu1 %1009  ;;  %v880_v42 = vmul.f32 %v2806_v51, %v864_v20  ;;  %v881_v14 = vmul.f32 %v2797_v46, %v865_v47  ;;  %v869_v51 = vld [vmem:[#allocation3 + $0x78] sm:$0xff]  ;;  %v958_v20 = vld [vmem:[#allocation4 + $0x48] sm:$0xff] }
 0x2f1   : > { %v885_v56 = vmul.f32 %v2843_v36, %v869_v51 }
 0x2f4   : > { %v2872_v30 = vpop.permute.xlu1 %1029 }
 0x300   : > { %1039 = vperm.xlu1 %1875, %v2840_v27  }
 0x305   : > { %1044 = vperm.xlu0 %1874, %v2843_v36   ;;  %v953_v36 = vld [vmem:[#allocation4 + $0x58] sm:$0xff] }
 0x34a   : > { %v891_v5 = vpop.xlane.xlu0 %890 }
 0x34b   : > { %v920_v6 = vadd.f32 %v891_v5, %v872_v1 }
 0x34c   : > { %v887_v40 = vpop.xlane.xlu1 %886 }
 0x34d   : > { %937 = vst.msk [vmem:[#allocation3 + $0x10] sm:$0xff] %vm934_vm1, %v920_v6  ;;  %v918_v37 = vadd.f32 %v887_v40, %v870_v8  ;;  %v868_v6 = vld [vmem:[#allocation3 + $0x70] sm:$0xff] }
 0x34e   : > { %v884_v40 = vmul.f32 %v2840_v27, %v868_v6  ;;  %v960_v6 = vld [vmem:[#allocation4 + $0x20] sm:$0xff] }
 0x34f   : > { %935 = vst.msk [vmem:[#allocation3] sm:$0xff] %vm934_vm1, %v918_v37 }
 0x350   : > { %v893_v13 = vpop.xlane.xlu1 %892 }
 0x351   : > { %v921_v19 = vadd.f32 %v893_v13, %v873_v11  ;;  %v866_v11 = vld [vmem:[#allocation3 + $0x60] sm:$0xff] }
 0x352   : > { %v889_v50 = vpop.xlane.xlu0 %888 }
 0x353   : > { %938 = vst.msk [vmem:[#allocation3 + $0x18] sm:$0xff] %vm934_vm1, %v921_v19  ;;  %v919_v41 = vadd.f32 %v889_v50, %v871_v12  ;;  %v882_v19 = vmul.f32 %v2815_v57, %v866_v11  ;;  %v883_v12 = vmul.f32 %v2809_v54, %v867_v55  ;;  %v952_v57 = vld [vmem:[#allocation4] sm:$0xff]  ;;  %v1050_v54 = vmul.f32 %v2850_v4, %v954_v17 }
 0x355   : > { %936 = vst.msk [vmem:[#allocation3 + $0x8] sm:$0xff] %vm934_vm1, %v919_v41 }
 0x358   : > { %v899_v39 = vpop.xlane.xlu0 %898 }
 0x359   : > { %v924_v21 = vadd.f32 %v899_v39, %v876_v7  ;;  %v951_v7 = vld [vmem:[#allocation4 + $0x30] sm:$0xff]  ;;  %v1049_v39 = vmul.f32 %v2852_v52, %v953_v36  ;;  %v957_v52 = vld [vmem:[#allocation4 + $0x8] sm:$0xff] }
 0x35b   : > { %941 = vst.msk [vmem:[#allocation3 + $0x30] sm:$0xff] %vm934_vm1, %v924_v21 }
 0x35c   : > { %v895_v18 = vpop.xlane.xlu0 %894 }
 0x35d   : > { %v922_v48 = vadd.f32 %v895_v18, %v874_v26  ;;  %v1047_v26 = vmul.f32 %v2846_v38, %v951_v7  ;;  %v1053_v38 = vmul.f32 %v2860_v2, %v957_v52 }
 0x35f   : > { %939 = vst.msk [vmem:[#allocation3 + $0x20] sm:$0xff] %vm934_vm1, %v922_v48 }
 0x364   : > { %v901_v45 = vpop.xlane.xlu1 %900 }
 0x365   : > { %v925_v25 = vadd.f32 %v901_v45, %v877_v23  ;;  %v1048_v45 = vmul.f32 %v2848_v59, %v952_v57 }
 0x367   : > { %942 = vst.msk [vmem:[#allocation3 + $0x38] sm:$0xff] %vm934_vm1, %v925_v25 }
 0x368   : > { %v897_v22 = vpop.xlane.xlu1 %896 }
 0x369   : > { %v923_v9 = vadd.f32 %v897_v22, %v875_v44  ;;  %v955_v22 = vld [vmem:[#allocation4 + $0x50] sm:$0xff] }
 0x36b   : > { %940 = vst.msk [vmem:[#allocation3 + $0x28] sm:$0xff] %vm934_vm1, %v923_v9  ;;  %v1051_v9 = vmul.f32 %v2856_v53, %v955_v22  ;;  %v962_v53 = vld [vmem:[#allocation4 + $0x38] sm:$0xff] }
 0x36c   : > { %v907_v33 = vpop.xlane.xlu0 %906  ;;  %v909_v29 = vpop.xlane.xlu1 %908 }
 0x36d   : > { %v928_v28 = vadd.f32 %v907_v33, %v880_v42  ;;  %v929_v63 = vadd.f32 %v909_v29, %v881_v14  ;;  %v956_v42 = vld [vmem:[#allocation4 + $0x68] sm:$0xff]  ;;  %v1054_v33 = vmul.f32 %v2854_v24, %v958_v20  ;;  %v961_v29 = vld [vmem:[#allocation4 + $0x10] sm:$0xff] }
 0x36e   : > { %v1052_v31 = vmul.f32 %v2858_v61, %v956_v42  ;;  %v1057_v2 = vmul.f32 %v2864_v58, %v961_v29 }
 0x36f   : > { %945 = vst.msk [vmem:[#allocation3 + $0x50] sm:$0xff] %vm934_vm1, %v928_v28  ;;  %946 = vst.msk [vmem:[#allocation3 + $0x58] sm:$0xff] %vm934_vm1, %v929_v63  ;;  %v959_v63 = vld [vmem:[#allocation4 + $0x40] sm:$0xff] }
 0x370   : > { %v903_v1 = vpop.xlane.xlu0 %902  ;;  %v905_v5 = vpop.xlane.xlu1 %904 }
 0x371   : > { %v926_v8 = vadd.f32 %v903_v1, %v878_v16  ;;  %v927_v46 = vadd.f32 %v905_v5, %v879_v0  ;;  %v1055_v5 = vmul.f32 %v2868_v62, %v959_v63 }
 0x373   : > { %943 = vst.msk [vmem:[#allocation3 + $0x40] sm:$0xff] %vm934_vm1, %v926_v8  ;;  %944 = vst.msk [vmem:[#allocation3 + $0x48] sm:$0xff] %vm934_vm1, %v927_v46  ;;  %v1058_v8 = vmul.f32 %v2862_v35, %v962_v53  ;;  %v965_v46 = vld [vmem:[#allocation4 + $0x78] sm:$0xff] }
 0x374   : > { %v915_v37 = vpop.xlane.xlu0 %914  ;;  %v917_v10 = vpop.xlane.xlu1 %916 }
 0x375   : > { %v932_v13 = vadd.f32 %v915_v37, %v884_v40  ;;  %v933_v49 = vadd.f32 %v917_v10, %v885_v56  ;;  %v1056_v37 = vmul.f32 %v2866_v60, %v960_v6  ;;  %v963_v10 = vld [vmem:[#allocation4 + $0x60] sm:$0xff] }
 0x377   : > { %949 = vst.msk [vmem:[#allocation3 + $0x70] sm:$0xff] %vm934_vm1, %v932_v13  ;;  %950 = vst.msk [vmem:[#allocation3 + $0x78] sm:$0xff] %vm934_vm1, %v933_v49  ;;  %v966_v13 = vld [vmem:[#allocation4 + $0x28] sm:$0xff] }
 0x378   : > { %v911_v50 = vpop.xlane.xlu0 %910  ;;  %v913_v41 = vpop.xlane.xlu1 %912 }
 0x379   : > { %v930_v15 = vadd.f32 %v911_v50, %v882_v19  ;;  %v931_v27 = vadd.f32 %v913_v41, %v883_v12  ;;  %v1059_v12 = vmul.f32 %v2872_v30, %v963_v10  ;;  %v964_v50 = vld [vmem:[#allocation4 + $0x70] sm:$0xff] }
 0x37a   : > { %v1060_v36 = vmul.f32 %v2870_v43, %v964_v50 }
 0x37b   : > { %947 = vst.msk [vmem:[#allocation3 + $0x60] sm:$0xff] %vm934_vm1, %v930_v15  ;;  %948 = vst.msk [vmem:[#allocation3 + $0x68] sm:$0xff] %vm934_vm1, %v931_v27 }
 0x37c   : > { %v1040_v40 = vpop.permute.xlu1 %1039 }
 0x37d   : > { %v1061_v55 = vmul.f32 %v1040_v40, %v965_v46 }
 0x380   : > { %v1045_v49 = vpop.permute.xlu0 %1044 }
 0x381   : > { %v1062_v15 = vmul.f32 %v1045_v49, %v966_v13 }
 0x38c   : > { %v1724_v21 = vpop.f32.mrf.mxu1 }
 0x38d   : > { %v1218_v18 = vadd.f32 %v1724_v21, %v1049_v39 }
 0x38e   : > { %v1153_v48 = vpop.f32.mrf.mxu1 }
 0x38f   : > { %1234 = vst [vmem:[#allocation4 + $0x58] sm:$0xff] %v1218_v18  ;;  %v1216_v32 = vadd.f32 %v1153_v48, %v1047_v26 }
 0x390   : > { %v1725_v23 = vpop.f32.mrf.mxu1 }
 0x391   : > { %1232 = vst [vmem:[#allocation4 + $0x30] sm:$0xff] %v1216_v32  ;;  %v1219_v3 = vadd.f32 %v1725_v23, %v1050_v54 }
 0x392   : > { %v1156_v25 = vpop.f32.mrf.mxu1 }
 0x393   : > { %1235 = vst [vmem:[#allocation4 + $0x18] sm:$0xff] %v1219_v3  ;;  %v1217_v44 = vadd.f32 %v1156_v25, %v1048_v45 }
 0x395   : > { %1233 = vst [vmem:[#allocation4] sm:$0xff] %v1217_v44 }
 0x39d   : > { %v1728_v47 = vpop.f32.mrf.mxu1 }
 0x39e   : > { %v1222_v4 = vadd.f32 %v1728_v47, %v1053_v38 }
 0x39f   : > { %v1169_v14 = vpop.f32.mrf.mxu1 }
 0x3a0   : > { %1238 = vst [vmem:[#allocation4 + $0x8] sm:$0xff] %v1222_v4  ;;  %v1220_v59 = vadd.f32 %v1169_v14, %v1051_v9 }
 0x3a1   : > { %v1729_v34 = vpop.f32.mrf.mxu1 }
 0x3a2   : > { %1236 = vst [vmem:[#allocation4 + $0x50] sm:$0xff] %v1220_v59  ;;  %v1223_v28 = vadd.f32 %v1729_v34, %v1054_v33 }
 0x3a3   : > { %v1172_v16 = vpop.f32.mrf.mxu1 }
 0x3a4   : > { %1239 = vst [vmem:[#allocation4 + $0x48] sm:$0xff] %v1223_v28  ;;  %v1221_v0 = vadd.f32 %v1172_v16, %v1052_v31 }
 0x3a5   : > { %v1732_v1 = vpop.f32.mrf.mxu1 }
 0x3a6   : > { %1237 = vst [vmem:[#allocation4 + $0x68] sm:$0xff] %v1221_v0  ;;  %v1226_v24 = vadd.f32 %v1732_v1, %v1057_v2 }
 0x3a7   : > { %v1185_v51 = vpop.f32.mrf.mxu1 }
 0x3a8   : > { %1242 = vst [vmem:[#allocation4 + $0x10] sm:$0xff] %v1226_v24  ;;  %v1224_v61 = vadd.f32 %v1185_v51, %v1055_v5 }
 0x3a9   : > { %v1733_v56 = vpop.f32.mrf.mxu1 }
 0x3aa   : > { %1240 = vst [vmem:[#allocation4 + $0x40] sm:$0xff] %v1224_v61  ;;  %v1227_v58 = vadd.f32 %v1733_v56, %v1058_v8 }
 0x3ab   : > { %v1188_v11 = vpop.f32.mrf.mxu1 }
 0x3ac   : > { %1243 = vst [vmem:[#allocation4 + $0x38] sm:$0xff] %v1227_v58  ;;  %v1225_v62 = vadd.f32 %v1188_v11, %v1056_v37 }
 0x3ad   : > { %v1736_v19 = vpop.f32.mrf.mxu1 }
 0x3ae   : > { %1241 = vst [vmem:[#allocation4 + $0x20] sm:$0xff] %v1225_v62  ;;  %v1230_v35 = vadd.f32 %v1736_v19, %v1061_v55 }
 0x3af   : > { %v1201_v41 = vpop.f32.mrf.mxu1 }
 0x3b0   : > { %1246 = vst [vmem:[#allocation4 + $0x78] sm:$0xff] %v1230_v35  ;;  %v1228_v27 = vadd.f32 %v1201_v41, %v1059_v12 }
 0x3b1   : > { %v1737_v60 = vpop.f32.mrf.mxu1 }
 0x3b2   : > { %1244 = vst [vmem:[#allocation4 + $0x60] sm:$0xff] %v1228_v27  ;;  %v1231_v7 = vadd.f32 %v1737_v60, %v1062_v15  ;;  %1267 = sbr.rel (%p1635_p10) target bundleno = 1122 (0x462), region = 52 }
 0x3b3   : > { %v1204_v39 = vpop.f32.mrf.mxu1 }
 0x3b4   : > { %1247 = vst [vmem:[#allocation4 + $0x28] sm:$0xff] %v1231_v7  ;;  %v1229_v17 = vadd.f32 %v1204_v39, %v1060_v36 }
 0x3b6   : > { %1245 = vst [vmem:[#allocation4 + $0x70] sm:$0xff] %v1229_v17 }
 0x3b7   : > { %v1270_v30 = vld [vmem:[#allocation3 + $0x10] sm:$0xff]  ;;  %v1268_v21 = vld [vmem:[#allocation3] sm:$0xff]  ;;  %v1271_v26 = vld [vmem:[#allocation3 + $0x18] sm:$0xff]  ;;  %v2232_v18 = vmov 0  }
 0x3b8   : > { %1965 = vset.pattern.permute.xlu1 %v2232_v18  ;;  %1964 = vset.pattern.permute.xlu0 %v2232_v18  ;;  %1966 = vrcp.f32 %v1270_v30  ;;  %v1269_v57 = vld [vmem:[#allocation3 + $0x8] sm:$0xff]  ;;  %v1272_v48 = vld [vmem:[#allocation3 + $0x20] sm:$0xff]  ;;  %v1275_v54 = vld [vmem:[#allocation3 + $0x38] sm:$0xff] }
 0x3b9   : > { %1968 = vrcp.f32 %v1268_v21  ;;  %v1273_v43 = vld [vmem:[#allocation3 + $0x28] sm:$0xff]  ;;  %v1274_v32 = vld [vmem:[#allocation3 + $0x30] sm:$0xff]  ;;  %v1276_v45 = vld [vmem:[#allocation3 + $0x40] sm:$0xff] }
 0x3ba   : > { %1970 = vrcp.f32 %v1271_v26  ;;  %v1277_v23 = vld [vmem:[#allocation3 + $0x48] sm:$0xff]  ;;  %v1279_v52 = vld [vmem:[#allocation3 + $0x58] sm:$0xff]  ;;  %v1278_v38 = vld [vmem:[#allocation3 + $0x50] sm:$0xff] }
 0x3bb   : > { %1972 = vrcp.f32 %v1269_v57  ;;  %v1281_v47 = vld [vmem:[#allocation3 + $0x68] sm:$0xff]  ;;  %v1280_v4 = vld [vmem:[#allocation3 + $0x60] sm:$0xff]  ;;  %v1283_v14 = vld [vmem:[#allocation3 + $0x78] sm:$0xff] }
 0x3bc   : > { %1974 = vrcp.f32 %v1273_v43  ;;  %v1282_v59 = vld [vmem:[#allocation3 + $0x70] sm:$0xff]  ;;  %v1302_v53 = vld [vmem:[#allocation4 + $0x58] sm:$0xff]  ;;  %v1301_v61 = vld [vmem:[#allocation4] sm:$0xff] }
 0x3bd   : > { %1976 = vrcp.f32 %v1272_v48  ;;  %v1300_v1 = vld [vmem:[#allocation4 + $0x30] sm:$0xff]  ;;  %v1303_v8 = vld [vmem:[#allocation4 + $0x18] sm:$0xff]  ;;  %v1305_v58 = vld [vmem:[#allocation4 + $0x68] sm:$0xff] }
 0x3be   : > { %1978 = vrcp.f32 %v1275_v54  ;;  %v1304_v10 = vld [vmem:[#allocation4 + $0x50] sm:$0xff]  ;;  %v1307_v49 = vld [vmem:[#allocation4 + $0x48] sm:$0xff]  ;;  %v1309_v15 = vld [vmem:[#allocation4 + $0x20] sm:$0xff] }
 0x3bf   : > { %1980 = vrcp.f32 %v1274_v32  ;;  %v1306_v19 = vld [vmem:[#allocation4 + $0x8] sm:$0xff]  ;;  %v1308_v27 = vld [vmem:[#allocation4 + $0x40] sm:$0xff]  ;;  %v1311_v17 = vld [vmem:[#allocation4 + $0x38] sm:$0xff] }
 0x3c0   : > { %1982 = vrcp.f32 %v1277_v23  ;;  %v1310_v30 = vld [vmem:[#allocation4 + $0x10] sm:$0xff]  ;;  %v1312_v48 = vld [vmem:[#allocation4 + $0x60] sm:$0xff] }
 0x3c1   : > { %1984 = vrcp.f32 %v1276_v45  ;;  %v1313_v43 = vld [vmem:[#allocation4 + $0x70] sm:$0xff] }
 0x3c2   : > { %1986 = vrcp.f32 %v1279_v52 }
 0x3c3   : > { %1988 = vrcp.f32 %v1278_v38 }
 0x3c4   : > { %1990 = vrcp.f32 %v1281_v47 }
 0x3c5   : > { %v1967_v3 = vpop.eup %1966  ;;  %1992 = vrcp.f32 %v1280_v4 }
 0x3c6   : > { %v1969_v25 = vpop.eup %1968  ;;  %1328 = vperm.xlu1 %1965, %v1967_v3   ;;  %1994 = vrcp.f32 %v1283_v14  ;;  %v1315_v3 = vld [vmem:[#allocation4 + $0x28] sm:$0xff] }
 0x3c7   : > { %v1971_v44 = vpop.eup %1970  ;;  %1318 = vperm.xlu0 %1964, %v1969_v25   ;;  %1996 = vrcp.f32 %v1282_v59  ;;  %v1314_v25 = vld [vmem:[#allocation4 + $0x78] sm:$0xff] }
 0x3c8   : > { %v1973_v22 = vpop.eup %1972 }
 0x3c9   : > { %v1975_v20 = vpop.eup %1974 }
 0x3ca   : > { %1333 = vperm.xlu1 %1965, %v1971_v44   ;;  %v1977_v9 = vpop.eup %1976 }
 0x3cb   : > { %1323 = vperm.xlu0 %1964, %v1973_v22   ;;  %v1979_v42 = vpop.eup %1978 }
 0x3cc   : > { %v1981_v33 = vpop.eup %1980 }
 0x3cd   : > { %v1983_v29 = vpop.eup %1982 }
 0x3ce   : > { %1343 = vperm.xlu1 %1965, %v1975_v20   ;;  %v1985_v34 = vpop.eup %1984 }
 0x3cf   : > { %1338 = vperm.xlu0 %1964, %v1977_v9   ;;  %v1987_v31 = vpop.eup %1986 }
 0x3d0   : > { %v1989_v28 = vpop.eup %1988 }
 0x3d1   : > { %v1991_v63 = vpop.eup %1990 }
 0x3d2   : > { %1353 = vperm.xlu1 %1965, %v1979_v42   ;;  %v1993_v16 = vpop.eup %1992 }
 0x3d3   : > { %1348 = vperm.xlu0 %1964, %v1981_v33   ;;  %v1995_v2 = vpop.eup %1994 }
 0x3d4   : > { %v1997_v0 = vpop.eup %1996 }
 0x3d6   : > { %1363 = vperm.xlu1 %1965, %v1983_v29  }
 0x3d7   : > { %1358 = vperm.xlu0 %1964, %v1985_v34  }
 0x3da   : > { %1373 = vperm.xlu1 %1965, %v1987_v31  }
 0x3db   : > { %1368 = vperm.xlu0 %1964, %v1989_v28  }
 0x3de   : > { %1383 = vperm.xlu1 %1965, %v1991_v63  }
 0x3df   : > { %1378 = vperm.xlu0 %1964, %v1993_v16  }
 0x3e2   : > { %1393 = vperm.xlu1 %1965, %v1995_v2  }
 0x3e3   : > { %1388 = vperm.xlu0 %1964, %v1997_v0  }
 0x441   : > { %v1329_v5 = vpop.permute.xlu1 %1328 }
 0x442   : > { %v1398_v24 = vmul.f32 %v1329_v5, %v1302_v53  ;;  %v1319_v6 = vpop.permute.xlu0 %1318 }
 0x443   : > { %v1396_v51 = vmul.f32 %v1319_v6, %v1300_v1 }
 0x444   : > { %1414 = vst [vmem:[%s2528_s6 + $0x10] sm:$0xff] %v1398_v24 }
 0x445   : > { %1412 = vst [vmem:[%s2528_s6] sm:$0xff] %v1396_v51  ;;  %v1334_v46 = vpop.permute.xlu1 %1333 }
 0x446   : > { %v1399_v40 = vmul.f32 %v1334_v46, %v1303_v8  ;;  %v1324_v56 = vpop.permute.xlu0 %1323 }
 0x447   : > { %v1397_v37 = vmul.f32 %v1324_v56, %v1301_v61 }
 0x448   : > { %1415 = vst [vmem:[%s2528_s6 + $0x18] sm:$0xff] %v1399_v40 }
 0x449   : > { %1413 = vst [vmem:[%s2528_s6 + $0x8] sm:$0xff] %v1397_v37  ;;  %v1344_v11 = vpop.permute.xlu1 %1343 }
 0x44a   : > { %v1401_v55 = vmul.f32 %v1344_v11, %v1305_v58  ;;  %v1339_v62 = vpop.permute.xlu0 %1338 }
 0x44b   : > { %v1400_v13 = vmul.f32 %v1339_v62, %v1304_v10 }
 0x44c   : > { %1417 = vst [vmem:[%s2528_s6 + $0x28] sm:$0xff] %v1401_v55 }
 0x44d   : > { %1416 = vst [vmem:[%s2528_s6 + $0x20] sm:$0xff] %v1400_v13  ;;  %v1354_v12 = vpop.permute.xlu1 %1353 }
 0x44e   : > { %v1403_v35 = vmul.f32 %v1354_v12, %v1307_v49  ;;  %v1349_v50 = vpop.permute.xlu0 %1348 }
 0x44f   : > { %v1402_v41 = vmul.f32 %v1349_v50, %v1306_v19 }
 0x450   : > { %1419 = vst [vmem:[%s2528_s6 + $0x38] sm:$0xff] %v1403_v35 }
 0x451   : > { %1418 = vst [vmem:[%s2528_s6 + $0x30] sm:$0xff] %v1402_v41  ;;  %v1364_v60 = vpop.permute.xlu1 %1363 }
 0x452   : > { %v1405_v36 = vmul.f32 %v1364_v60, %v1309_v15  ;;  %v1359_v7 = vpop.permute.xlu0 %1358 }
 0x453   : > { %v1404_v39 = vmul.f32 %v1359_v7, %v1308_v27 }
 0x454   : > { %1421 = vst [vmem:[%s2528_s6 + $0x48] sm:$0xff] %v1405_v36 }
 0x455   : > { %1420 = vst [vmem:[%s2528_s6 + $0x40] sm:$0xff] %v1404_v39  ;;  %v1374_v21 = vpop.permute.xlu1 %1373 }
 0x456   : > { %v1407_v26 = vmul.f32 %v1374_v21, %v1311_v17  ;;  %v1369_v18 = vpop.permute.xlu0 %1368 }
 0x457   : > { %v1406_v57 = vmul.f32 %v1369_v18, %v1310_v30 }
 0x458   : > { %1423 = vst [vmem:[%s2528_s6 + $0x58] sm:$0xff] %v1407_v26 }
 0x459   : > { %1422 = vst [vmem:[%s2528_s6 + $0x50] sm:$0xff] %v1406_v57  ;;  %v1384_v54 = vpop.permute.xlu1 %1383 }
 0x45a   : > { %v1409_v32 = vmul.f32 %v1384_v54, %v1313_v43  ;;  %v1379_v23 = vpop.permute.xlu0 %1378 }
 0x45b   : > { %v1408_v45 = vmul.f32 %v1379_v23, %v1312_v48 }
 0x45c   : > { %1425 = vst [vmem:[%s2528_s6 + $0x68] sm:$0xff] %v1409_v32 }
 0x45d   : > { %1424 = vst [vmem:[%s2528_s6 + $0x60] sm:$0xff] %v1408_v45  ;;  %v1394_v44 = vpop.permute.xlu1 %1393 }
 0x45e   : > { %v1411_v52 = vmul.f32 %v1394_v44, %v1315_v3  ;;  %v1389_v22 = vpop.permute.xlu0 %1388 }
 0x45f   : > { %v1410_v38 = vmul.f32 %v1389_v22, %v1314_v25 }
 0x460   : > { %1427 = vst [vmem:[%s2528_s6 + $0x78] sm:$0xff] %v1411_v52 }
 0x461   : > { %1426 = vst [vmem:[%s2528_s6 + $0x70] sm:$0xff] %v1410_v38 }
 0x462 PF: > { %s3095_s20 = sld [smem:[#allocation19_spill]]  ;;  %s1444_s10 = sshll.u32 %s2528_s6, 4  ;;  %s2940_s10 = int_to_ptr.vmem [resolvable:$true] %s1444_s10 }
 0x463   : > { %s3096_s29 = sld [smem:[#allocation20_spill]]  ;;  %s1429_s1 = scalar_lea.sflag [#allocation7], %s2507_s7 }
 0x464   : > { %s3097_s5 = sld [smem:[#allocation27_spill]]  ;;  %s2082_s25 = scalar_lea.vmem %s2940_s10, 2048 }
 0x465   : > { %s3098_s28 = sld [smem:[#allocation32_spill]]  ;;  %p2083_p9 = scmp.ne.s32.totalorder %s2940_s10, %s2082_s25 }
 0x466   : > { %s2233_s16 = smov [#allocation11]  }
 0x467   : > { %s2086_s22 = sshll.u32 %s2233_s16, 4  ;;  %s2087_s22 = int_to_ptr.vmem [resolvable:$false] %s2086_s22 }
 0x468   : > { %s1637_s9 = sshll.u32 %s3095_s20, 4  ;;  %s2088_s18 = scalar_lea.vmem %s2087_s22, 4096 }
 0x469   : > { %s1638_s12 = sshll.u32 %s3096_s29, 5  ;;  %p2089_p6 = scmp.lt.s32.totalorder %s2940_s10, %s2087_s22 }
 0x46a   : > { %s1441_s3 = sadd.s32 %s1638_s12, %s1637_s9  ;;  %p3099_p1 = scmp.ne.s32.totalorder %s3097_s5, 0 }
 0x46b   : > { %s1639_s8 = sshll.u32 %s1441_s3, 7  ;;  %p2090_p0 = scmp.lt.s32.totalorder %s2088_s18, %s2082_s25 }
 0x46c   : > { %s2945_s15 = scalar_lea.hbm %s3098_s28, %s1639_s8  ;;  %p2084_p13 = pnand %p2083_p9, %p3099_p1 }
 0x46d   : > { %p2091_p11 = por %p2090_p0, %p2089_p6 }
 0x46e   : > { %p2085_p7 = pneg %p2084_p13 }
 0x470   : > { %p2092_p4 = pnand %p2091_p11, %p2085_p7 }
 0x472   : > { %2095 = shalt.err (!%p2092_p4)
}
 0x473   : > { %s2096_s4 = scalar_lea.hbm %s2945_s15, 2048  ;;  %s2100_s19 = scalar_lea.hbm %s3098_s28, 16384 }
 0x474   : > { %p2097_p3 = scmp.ne.s32.totalorder %s2945_s15, %s2096_s4  ;;  %p2101_p8 = scmp.lt.s32.totalorder %s2945_s15, %s3098_s28 }
 0x475   : > { %p2102_p12 = scmp.lt.s32.totalorder %s2100_s19, %s2096_s4 }
 0x476   : > { %p2098_p5 = pnand %p2097_p3, %p3099_p1 }
 0x477   : > { %p2103_p10 = por %p2102_p12, %p2101_p8 }
 0x478   : > { %p2099_p2 = pneg %p2098_p5 }
 0x47a   : > { %p2104_p9 = pnand %p2103_p10, %p2099_p2 }
 0x47c   : > { %2107 = shalt.err (!%p2104_p9)
}
 0x47d   : > { %s2234_s9 = smov 128   ;;  %s2235_s12 = smov 8  }
 0x47e   : > { %1744 = dma.vmem_to_hbm [thread:$0]  (%p3099_p1), %s2940_s10, 2048, %s2945_s15, %s1429_s1, %s2234_s9, %s2234_s9, %s2235_s12  }
 0x47f PF: > { %s3100_s3 = sld [smem:[#allocation16_spill]]  ;;  %p1761_p13 = scmp.ge.s32.totalorder %s2222_s24, 2 }
 0x480   : > { %s3101_s8 = sld [smem:[#allocation29_spill]] }
 0x485   : > { %s1459_s2 = sand.u32 1, %s3100_s3  }
 0x486   : > { %p3102_p7 = scmp.ne.s32.totalorder %s3101_s8, 0  ;;  %s1460_s27 = scalar_lea.sflag [#allocation7], %s1459_s2 }
 0x488   : > { %p1757_p6 = pnand %p1761_p13, %p3102_p7 }
 0x48a   : > { %p1758_p0 = pneg %p1757_p6 }
 0x48c   : > { %2169 = dma.done.wait (%p1758_p0), %s1460_s27, 2048  }
 0x48d   : > { %2171 = vsyncadd (%p1758_p0), %s1460_s27, 4294965248  ;;  %s22_s24 = sadd.s32 1, %s2222_s24   ;;  %s3104_s12 = sld [smem:[#allocation15_spill]] }
 0x48e   : > { %p2975_p11 = scmp.ge.s32.totalorder %s22_s24, 18   ;;  %s3105_s15 = sld [smem:[#allocation17_spill]] }
 0x48f   : > { %s3106_s7 = smov %s2454_s13  ;;  %s3107_s19 = sld [smem:[#allocation21_spill]] }
 0x490   : > { %s3108_s22 = sld [smem:[#allocation26_spill]]  ;;  %s3110_s13 = smov %s2182_s14 }
 0x491   : > { %s3109_s5 = sld [smem:[#allocation28_spill]]  ;;  %s3111_s14 = smov %s2459_s30 }
 0x492   : > { %s3112_s16 = smov %s2194_s17  ;;  %s3113_s17 = smov %s3106_s7 }
 0x493   : > { %s3114_s18 = smov %s2210_s21  ;;  %s3115_s20 = smov %s2218_s23 }
 0x494   : > { %s3116_s21 = smov %s3119_s26  ;;  %21 = sbr.rel (!%p2975_p11) target bundleno = 16 (0x10), region = 109 }
 0x497   : > { %s3117_s23 = smov %s3109_s5 }
 0x499   :  { %1465 = vsyncpa [#allocation6], 1 }
 0x49a   :  { %1467 = vsyncpa [#allocation6 + $0x1], 1 }
 0x49b   :  { %1468 = vsyncpa [#allocation9], 1 }
 0x49c   :  { %1470 = vsyncpa [#allocation9 + $0x1], 1 }
 0x49d   :  { %1471 = vsyncpa [#allocation7], 1 }
 0x49e   :  { %1473 = vsyncpa [#allocation7 + $0x1], 1 }

</bundles_post_ra>
